<compile_context>
chip_gen: v5e
topology: v5e:2x2
jax: 0.10.0
libtpu: 0.0.40
codegen_flags: <defaults>
</compile_context>

<pallas_src>
import math

import jax
import jax.numpy as jnp
from jax.experimental import pallas as pl
from jax.experimental.pallas import tpu as pltpu

H = 32          # hidden_dim
N = 8           # num_gaussian_component
B = 2           # batch
D = 3 * H       # 96  (the "hidden_size" used throughout the module)
EPS = 1e-12


def gmm_projection_kernel(gmm_ref, rel_ref,
                          w_rel_ref, b_rel_ref,     # [2H, 2D], [1, 2D]  ({Wz|Wh}, ones folded)
                          u_ref, bu_ref,            # [D, 2D],  [1, 2D]  ({Uz|Uh})
                          q_w_ref, q_b_ref,         # [D, D],   [1, D]
                          ln_ref,                   # [8, D]: lnz_w,lnz_b,lnh_w,lnh_b,ln1_w,ln1_b,ln2_w,ln2_b
                          out_ref):
    x = gmm_ref[...]            # [B, N, D]
    r = rel_ref[...]            # [B, 2H]
    ln = ln_ref[...]            # [8, D]

    def _layer_norm(v, w, b):
        u = jnp.mean(v, axis=-1, keepdims=True)
        s = jnp.mean((v - u) ** 2, axis=-1, keepdims=True)
        return w * ((v - u) * jax.lax.rsqrt(s + EPS)) + b

    def _softmax_components(v):                       # softmax over axis 1 (components)
        m = jnp.max(v, axis=1, keepdims=True)
        e = jnp.exp(v - m)
        return e * pl.reciprocal(jnp.sum(e, axis=1, keepdims=True))

    # normalized gmm embedding: softmax the weight lanes (< H) over components,
    # mean/variance lanes pass through untouched (lane-mask select, no concat).
    lane = jax.lax.broadcasted_iota(jnp.int32, (B, N, D), 2)
    ng = jnp.where(lane < H, _softmax_components(x), x)          # [B, N, D]
    ng_flat = ng.reshape(B * N, D)

    # fused {Wz|Wh} projection of the relation embedding (ones-block folded into bias)
    relW = jnp.dot(r, w_rel_ref[...],
                   preferred_element_type=jnp.float32) + b_rel_ref[...]      # [B, 2D]
    relW_z = _layer_norm(relW[:, :D], ln[0:1, :], ln[1:2, :])[:, None, :]    # [B, 1, D]
    relW_h = _layer_norm(relW[:, D:], ln[2:3, :], ln[3:4, :])[:, None, :]    # [B, 1, D]

    # fused {Uz|Uh} projection of the normalized gmm embedding
    ngU = (jnp.dot(ng_flat, u_ref[...], preferred_element_type=jnp.float32)
           + bu_ref[...]).reshape(B, N, 2 * D)                               # [B, N, 2D]

    # gated update (dropout == identity)
    z = jax.nn.sigmoid(relW_z + ngU[:, :, :D])
    h_hat = jnp.maximum(relW_h + ngU[:, :, D:], 0.0)
    h = (1.0 - z) * ng + z * h_hat                                           # [B, N, D]

    p = _layer_norm(h, ln[4:5, :], ln[5:6, :])                               # [B, N, D]

    # SelfAttention: K = V = Q = query(p)  (the module only uses self.query)
    q = (jnp.dot(p.reshape(B * N, D), q_w_ref[...],
                 preferred_element_type=jnp.float32)
         + q_b_ref[...]).reshape(B, N, D)                                    # [B, N, D]
    scores = jax.lax.dot_general(
        q, q, (((2,), (2,)), ((0,), (0,))),
        preferred_element_type=jnp.float32) * (1.0 / math.sqrt(D))           # [B, N, N]
    m = jnp.max(scores, axis=-1, keepdims=True)
    e = jnp.exp(scores - m)
    probs = e * pl.reciprocal(jnp.sum(e, axis=-1, keepdims=True))
    attn = jax.lax.dot_general(probs, q, (((2,), (1,)), ((0,), (0,))),
                               preferred_element_type=jnp.float32)           # [B, N, D]

    p2 = _layer_norm(attn, ln[6:7, :], ln[7:8, :])                           # [B, N, D]

    # final chunks (source softmaxes the WHOLE embedding over components ->
    # the "weight" part of the output is 3H wide -> output width = 5H).
    # Written as three static lane-slice stores (no 160-lane concatenate).
    out_ref[:, :, :D] = _softmax_components(p2)
    out_ref[:, :, D:D + H] = p2[:, :, H:2 * H]
    out_ref[:, :, D + H:] = jnp.abs(p2[:, :, 2 * H:])


def gmm_projection(gmm, rel, packed):
    w_rel, b_rel, u_fused, bu_fused, q_w, q_b, ln_stack = packed
    in_specs = [
        pl.BlockSpec((B, N, D), lambda i: (0, 0, 0)),        # gmm_embedding
        pl.BlockSpec((B, 2 * H), lambda i: (0, 0)),          # relation embedding
        pl.BlockSpec((2 * H, 2 * D), lambda i: (0, 0)),      # fused {Wz|Wh} (ones folded)
        pl.BlockSpec((1, 2 * D), lambda i: (0, 0)),          # fused W bias
        pl.BlockSpec((D, 2 * D), lambda i: (0, 0)),          # fused {Uz|Uh}
        pl.BlockSpec((1, 2 * D), lambda i: (0, 0)),          # fused U bias
        pl.BlockSpec((D, D), lambda i: (0, 0)),              # query weight
        pl.BlockSpec((1, D), lambda i: (0, 0)),              # query bias
        pl.BlockSpec((8, D), lambda i: (0, 0)),              # stacked LayerNorm params
    ]
    out_spec = pl.BlockSpec((B, N, 5 * H), lambda i: (0, 0, 0))

    return pl.pallas_call(
        gmm_projection_kernel,
        out_shape=jax.ShapeDtypeStruct((B, N, 5 * H), jnp.float32),
        grid_spec=pltpu.PrefetchScalarGridSpec(
            num_scalar_prefetch=0,
            grid=(1,),                        # single step: whole problem fits in VMEM
            in_specs=in_specs,
            out_specs=out_spec,
        ),
        compiler_params=pltpu.CompilerParams(
            dimension_semantics=("arbitrary",)),
    )(gmm, rel, w_rel, b_rel, u_fused, bu_fused, q_w, q_b, ln_stack)


def init_params(key):
    """Deterministic, PyTorch-Linear-style init. Linear weights stored as [in,out]."""
    def linear(k, fan_in, fan_out):
        k1, k2 = jax.random.split(k)
        bound = 1.0 / math.sqrt(fan_in)
        w = jax.random.uniform(k1, (fan_in, fan_out), jnp.float32, -bound, bound)
        b = jax.random.uniform(k2, (1, fan_out), jnp.float32, -bound, bound)
        return w, b

    keys = jax.random.split(key, 5)
    wz_w, wz_b = linear(keys[0], D, D)
    uz_w, uz_b = linear(keys[1], D, D)
    wh_w, wh_b = linear(keys[2], D, D)
    uh_w, uh_b = linear(keys[3], D, D)
    q_w, q_b = linear(keys[4], D, D)
    ones = jnp.ones((1, D), jnp.float32)
    zeros = jnp.zeros((1, D), jnp.float32)
    return (wz_w, wz_b, uz_w, uz_b, ones, zeros,      # Wz, Uz, layer_norm_z
            wh_w, wh_b, uh_w, uh_b, ones, zeros,      # Wh, Uh, layer_norm_h
            q_w, q_b, ones, zeros, ones, zeros)       # query, layer_norm1, layer_norm2


def pack_params(params):
    """One-time weight fold/packing (done once, outside the kernel call path)."""
    (wz_w, wz_b, uz_w, uz_b, lnz_w, lnz_b,
     wh_w, wh_b, uh_w, uh_b, lnh_w, lnh_b,
     q_w, q_b, ln1_w, ln1_b, ln2_w, ln2_b) = params

    w_fused = jnp.concatenate([wz_w, wh_w], axis=1)                 # [D, 2D]
    b_fused = jnp.concatenate([wz_b, wh_b], axis=1)                 # [1, 2D]
    # fold the implicit ones(H) prefix of weighted_relation_embedding into the bias
    b_rel = b_fused + jnp.sum(w_fused[:H, :], axis=0, keepdims=True)
    w_rel = w_fused[H:, :]                                          # [2H, 2D]

    u_fused = jnp.concatenate([uz_w, uh_w], axis=1)                 # [D, 2D]
    bu_fused = jnp.concatenate([uz_b, uh_b], axis=1)                # [1, 2D]

    ln_stack = jnp.concatenate([lnz_w, lnz_b, lnh_w, lnh_b,
                                ln1_w, ln1_b, ln2_w, ln2_b], axis=0)  # [8, D]
    return (w_rel, b_rel, u_fused, bu_fused, q_w, q_b, ln_stack)


def reference(gmm, rel, params):
    """Pure-JAX reference mirroring the PyTorch forward (dropout = identity)."""
    (wz_w, wz_b, uz_w, uz_b, lnz_w, lnz_b,
     wh_w, wh_b, uh_w, uh_b, lnh_w, lnh_b,
     q_w, q_b, ln1_w, ln1_b, ln2_w, ln2_b) = params

    rel = rel[:, None, :]
    wre = jnp.concatenate([jnp.ones_like(rel[..., :H]), rel], axis=-1)
    gw, gm, gv = jnp.split(gmm, 3, axis=-1)
    ng = jnp.concatenate([jax.nn.softmax(gw, axis=1), gm, gv], axis=-1)

    def ln(x, w, b):
        u = x.mean(-1, keepdims=True)
        s = ((x - u) ** 2).mean(-1, keepdims=True)
        return w * ((x - u) / jnp.sqrt(s + EPS)) + b

    hi = jax.lax.Precision.HIGHEST

    def lin(x, w, b):
        return jnp.einsum('bnd,de->bne', x, w, precision=hi) + b

    z = jax.nn.sigmoid(ln(lin(wre, wz_w, wz_b), lnz_w, lnz_b) + lin(ng, uz_w, uz_b))
    h_hat = jax.nn.relu(ln(lin(wre, wh_w, wh_b), lnh_w, lnh_b) + lin(ng, uh_w, uh_b))
    h = (1 - z) * ng + z * h_hat
    p = ln(h, ln1_w, ln1_b)
    q = lin(p, q_w, q_b)
    scores = jnp.einsum('bnd,bmd->bnm', q, q, precision=hi) / math.sqrt(D)
    probs = jax.nn.softmax(scores, axis=-1)
    attn = jnp.einsum('bnm,bmd->bnd', probs, q, precision=hi)
    p2 = ln(attn, ln2_w, ln2_b)
    _, pm, pv = jnp.split(p2, 3, axis=-1)
    pw = jax.nn.softmax(p2, axis=1)
    return jnp.concatenate([pw, pm, jnp.abs(pv)], axis=-1)


if __name__ == "__main__":
    key = jax.random.PRNGKey(0)
    k_gmm, k_rel, k_par = jax.random.split(key, 3)
    gmm = jax.random.normal(k_gmm, (B, N, D), jnp.float32)
    rel = jax.random.normal(k_rel, (B, 2 * H), jnp.float32)
    params = init_params(k_par)
    packed = jax.block_until_ready(pack_params(params))   # one-time fold

    out = gmm_projection(gmm, rel, packed)
    out = jax.block_until_ready(out)

    ref = reference(gmm, rel, params)
    assert out.shape == (B, N, 5 * H), out.shape
    assert jnp.allclose(out, ref, rtol=1e-3, atol=1e-3), \
        float(jnp.max(jnp.abs(out - ref)))
    print("KERNEL_OK")
</pallas_src>

<mosaic_0001>
module attributes {stable_mosaic.version = 11 : i64} {
  func.func @gmm_projection_kernel(%arg0: i32, %arg1: memref<2x8x96xf32, #tpu.memory_space<vmem>>, %arg2: memref<2x64xf32, #tpu.memory_space<vmem>>, %arg3: memref<64x192xf32, #tpu.memory_space<vmem>>, %arg4: memref<1x192xf32, #tpu.memory_space<vmem>>, %arg5: memref<96x192xf32, #tpu.memory_space<vmem>>, %arg6: memref<1x192xf32, #tpu.memory_space<vmem>>, %arg7: memref<96x96xf32, #tpu.memory_space<vmem>>, %arg8: memref<1x96xf32, #tpu.memory_space<vmem>>, %arg9: memref<8x96xf32, #tpu.memory_space<vmem>>, %arg10: memref<2x8x160xf32, #tpu.memory_space<vmem>>) attributes {dimension_semantics = [#tpu.dimension_semantics<arbitrary>], iteration_bounds = array<i64: 1>, scalar_prefetch = 0 : i64, scratch_operands = 0 : i64, tpu.core_type = #tpu.core_type<tc>, window_params = [{pipeline_mode = #tpu.pipeline_mode<synchronous>, transform_indices = @transform_0, window_bounds = array<i64: 2, 8, 96>}, {pipeline_mode = #tpu.pipeline_mode<synchronous>, transform_indices = @transform_1, window_bounds = array<i64: 2, 64>}, {pipeline_mode = #tpu.pipeline_mode<synchronous>, transform_indices = @transform_2, window_bounds = array<i64: 64, 192>}, {pipeline_mode = #tpu.pipeline_mode<synchronous>, transform_indices = @transform_3, window_bounds = array<i64: 1, 192>}, {pipeline_mode = #tpu.pipeline_mode<synchronous>, transform_indices = @transform_4, window_bounds = array<i64: 96, 192>}, {pipeline_mode = #tpu.pipeline_mode<synchronous>, transform_indices = @transform_5, window_bounds = array<i64: 1, 192>}, {pipeline_mode = #tpu.pipeline_mode<synchronous>, transform_indices = @transform_6, window_bounds = array<i64: 96, 96>}, {pipeline_mode = #tpu.pipeline_mode<synchronous>, transform_indices = @transform_7, window_bounds = array<i64: 1, 96>}, {pipeline_mode = #tpu.pipeline_mode<synchronous>, transform_indices = @transform_8, window_bounds = array<i64: 8, 96>}, {pipeline_mode = #tpu.pipeline_mode<synchronous>, transform_indices = @transform_9, window_bounds = array<i64: 2, 8, 160>}]} {
    %c0 = arith.constant 0 : index
    %c0_0 = arith.constant 0 : index
    %c0_1 = arith.constant 0 : index
    %0 = vector.load %arg1[%c0, %c0_0, %c0_1] : memref<2x8x96xf32, #tpu.memory_space<vmem>>, vector<2x8x96xf32>
    %c0_2 = arith.constant 0 : index
    %c0_3 = arith.constant 0 : index
    %1 = vector.load %arg2[%c0_2, %c0_3] : memref<2x64xf32, #tpu.memory_space<vmem>>, vector<2x64xf32>
    %c0_4 = arith.constant 0 : index
    %c0_5 = arith.constant 0 : index
    %2 = vector.load %arg9[%c0_4, %c0_5] : memref<8x96xf32, #tpu.memory_space<vmem>>, vector<8x96xf32>
    %3 = tpu.iota {dimensions = array<i32: 2>} : vector<2x8x96xi32>
    %c32_i32 = arith.constant 32 : i32
    %4 = vector.broadcast %c32_i32 : i32 to vector<2x8x96xi32>
    %5 = arith.cmpi slt, %3, %4 : vector<2x8x96xi32>
    %cst = arith.constant dense<0xFF800000> : vector<2x96xf32>
    %6 = vector.multi_reduction <maximumf>, %0, %cst [1] : vector<2x8x96xf32> to vector<2x96xf32>
    %7 = vector.shape_cast %6 : vector<2x96xf32> to vector<2x1x96xf32>
    %8 = vector.broadcast %7 : vector<2x1x96xf32> to vector<2x8x96xf32>
    %9 = arith.subf %0, %8 : vector<2x8x96xf32>
    %10 = math.exp %9 : vector<2x8x96xf32>
    %cst_6 = arith.constant dense<0.000000e+00> : vector<2x96xf32>
    %11 = vector.multi_reduction <add>, %10, %cst_6 [1] : vector<2x8x96xf32> to vector<2x96xf32>
    %12 = vector.shape_cast %11 : vector<2x96xf32> to vector<2x1x96xf32>
    %13 = tpu.reciprocal %12 : vector<2x1x96xf32> -> vector<2x1x96xf32>
    %14 = vector.broadcast %13 : vector<2x1x96xf32> to vector<2x8x96xf32>
    %15 = arith.mulf %10, %14 : vector<2x8x96xf32>
    %16 = arith.select %5, %15, %0 : vector<2x8x96xi1>, vector<2x8x96xf32>
    %17 = vector.shape_cast %16 : vector<2x8x96xf32> to vector<16x96xf32>
    %c0_7 = arith.constant 0 : index
    %c0_8 = arith.constant 0 : index
    %18 = vector.load %arg3[%c0_7, %c0_8] : memref<64x192xf32, #tpu.memory_space<vmem>>, vector<64x192xf32>
    %cst_9 = arith.constant dense<0.000000e+00> : vector<2x192xf32>
    %19 = tpu.matmul %1, %18, %cst_9 {dimension_numbers = #tpu.dot_dimension_numbers<[1], [0], [0], [1], [0, 0, 1, 1], [], []>} : vector<2x64xf32>, vector<64x192xf32>, vector<2x192xf32> -> vector<2x192xf32>
    %c0_10 = arith.constant 0 : index
    %c0_11 = arith.constant 0 : index
    %20 = vector.load %arg4[%c0_10, %c0_11] : memref<1x192xf32, #tpu.memory_space<vmem>>, vector<1x192xf32>
    %21 = vector.broadcast %20 : vector<1x192xf32> to vector<2x192xf32>
    %22 = arith.addf %19, %21 : vector<2x192xf32>
    %23 = vector.extract_strided_slice %22 {offsets = [0, 0], sizes = [2, 96], strides = [1, 1]} : vector<2x192xf32> to vector<2x96xf32>
    %24 = vector.extract_strided_slice %2 {offsets = [0, 0], sizes = [1, 96], strides = [1, 1]} : vector<8x96xf32> to vector<1x96xf32>
    %25 = vector.extract_strided_slice %2 {offsets = [1, 0], sizes = [1, 96], strides = [1, 1]} : vector<8x96xf32> to vector<1x96xf32>
    %cst_12 = arith.constant dense<0.000000e+00> : vector<2xf32>
    %26 = vector.multi_reduction <add>, %23, %cst_12 [1] : vector<2x96xf32> to vector<2xf32>
    %27 = vector.shape_cast %26 : vector<2xf32> to vector<2x1xf32>
    %cst_13 = arith.constant 9.600000e+01 : f32
    %28 = vector.broadcast %cst_13 : f32 to vector<2x1xf32>
    %29 = arith.divf %27, %28 : vector<2x1xf32>
    %30 = vector.broadcast %29 : vector<2x1xf32> to vector<2x96xf32>
    %31 = arith.subf %23, %30 : vector<2x96xf32>
    %32 = arith.mulf %31, %31 : vector<2x96xf32>
    %cst_14 = arith.constant dense<0.000000e+00> : vector<2xf32>
    %33 = vector.multi_reduction <add>, %32, %cst_14 [1] : vector<2x96xf32> to vector<2xf32>
    %34 = vector.shape_cast %33 : vector<2xf32> to vector<2x1xf32>
    %cst_15 = arith.constant 9.600000e+01 : f32
    %35 = vector.broadcast %cst_15 : f32 to vector<2x1xf32>
    %36 = arith.divf %34, %35 : vector<2x1xf32>
    %37 = vector.broadcast %29 : vector<2x1xf32> to vector<2x96xf32>
    %38 = arith.subf %23, %37 : vector<2x96xf32>
    %cst_16 = arith.constant 9.99999996E-13 : f32
    %39 = vector.broadcast %cst_16 : f32 to vector<2x1xf32>
    %40 = arith.addf %36, %39 : vector<2x1xf32>
    %41 = math.rsqrt %40 : vector<2x1xf32>
    %42 = vector.broadcast %41 : vector<2x1xf32> to vector<2x96xf32>
    %43 = arith.mulf %38, %42 : vector<2x96xf32>
    %44 = vector.broadcast %24 : vector<1x96xf32> to vector<2x96xf32>
    %45 = arith.mulf %44, %43 : vector<2x96xf32>
    %46 = vector.broadcast %25 : vector<1x96xf32> to vector<2x96xf32>
    %47 = arith.addf %45, %46 : vector<2x96xf32>
    %48 = vector.shape_cast %47 : vector<2x96xf32> to vector<2x1x96xf32>
    %49 = vector.extract_strided_slice %22 {offsets = [0, 96], sizes = [2, 96], strides = [1, 1]} : vector<2x192xf32> to vector<2x96xf32>
    %50 = vector.extract_strided_slice %2 {offsets = [2, 0], sizes = [1, 96], strides = [1, 1]} : vector<8x96xf32> to vector<1x96xf32>
    %51 = vector.extract_strided_slice %2 {offsets = [3, 0], sizes = [1, 96], strides = [1, 1]} : vector<8x96xf32> to vector<1x96xf32>
    %cst_17 = arith.constant dense<0.000000e+00> : vector<2xf32>
    %52 = vector.multi_reduction <add>, %49, %cst_17 [1] : vector<2x96xf32> to vector<2xf32>
    %53 = vector.shape_cast %52 : vector<2xf32> to vector<2x1xf32>
    %cst_18 = arith.constant 9.600000e+01 : f32
    %54 = vector.broadcast %cst_18 : f32 to vector<2x1xf32>
    %55 = arith.divf %53, %54 : vector<2x1xf32>
    %56 = vector.broadcast %55 : vector<2x1xf32> to vector<2x96xf32>
    %57 = arith.subf %49, %56 : vector<2x96xf32>
    %58 = arith.mulf %57, %57 : vector<2x96xf32>
    %cst_19 = arith.constant dense<0.000000e+00> : vector<2xf32>
    %59 = vector.multi_reduction <add>, %58, %cst_19 [1] : vector<2x96xf32> to vector<2xf32>
    %60 = vector.shape_cast %59 : vector<2xf32> to vector<2x1xf32>
    %cst_20 = arith.constant 9.600000e+01 : f32
    %61 = vector.broadcast %cst_20 : f32 to vector<2x1xf32>
    %62 = arith.divf %60, %61 : vector<2x1xf32>
    %63 = vector.broadcast %55 : vector<2x1xf32> to vector<2x96xf32>
    %64 = arith.subf %49, %63 : vector<2x96xf32>
    %cst_21 = arith.constant 9.99999996E-13 : f32
    %65 = vector.broadcast %cst_21 : f32 to vector<2x1xf32>
    %66 = arith.addf %62, %65 : vector<2x1xf32>
    %67 = math.rsqrt %66 : vector<2x1xf32>
    %68 = vector.broadcast %67 : vector<2x1xf32> to vector<2x96xf32>
    %69 = arith.mulf %64, %68 : vector<2x96xf32>
    %70 = vector.broadcast %50 : vector<1x96xf32> to vector<2x96xf32>
    %71 = arith.mulf %70, %69 : vector<2x96xf32>
    %72 = vector.broadcast %51 : vector<1x96xf32> to vector<2x96xf32>
    %73 = arith.addf %71, %72 : vector<2x96xf32>
    %74 = vector.shape_cast %73 : vector<2x96xf32> to vector<2x1x96xf32>
    %c0_22 = arith.constant 0 : index
    %c0_23 = arith.constant 0 : index
    %75 = vector.load %arg5[%c0_22, %c0_23] : memref<96x192xf32, #tpu.memory_space<vmem>>, vector<96x192xf32>
    %cst_24 = arith.constant dense<0.000000e+00> : vector<16x192xf32>
    %76 = tpu.matmul %17, %75, %cst_24 {dimension_numbers = #tpu.dot_dimension_numbers<[1], [0], [0], [1], [0, 0, 1, 1], [], []>} : vector<16x96xf32>, vector<96x192xf32>, vector<16x192xf32> -> vector<16x192xf32>
    %c0_25 = arith.constant 0 : index
    %c0_26 = arith.constant 0 : index
    %77 = vector.load %arg6[%c0_25, %c0_26] : memref<1x192xf32, #tpu.memory_space<vmem>>, vector<1x192xf32>
    %78 = vector.broadcast %77 : vector<1x192xf32> to vector<16x192xf32>
    %79 = arith.addf %76, %78 : vector<16x192xf32>
    %80 = vector.shape_cast %79 : vector<16x192xf32> to vector<2x8x192xf32>
    %81 = vector.extract_strided_slice %80 {offsets = [0, 0, 0], sizes = [2, 8, 96], strides = [1, 1, 1]} : vector<2x8x192xf32> to vector<2x8x96xf32>
    %82 = vector.broadcast %48 : vector<2x1x96xf32> to vector<2x8x96xf32>
    %83 = arith.addf %82, %81 : vector<2x8x96xf32>
    %84 = arith.negf %83 : vector<2x8x96xf32>
    %85 = math.exp %84 : vector<2x8x96xf32>
    %cst_27 = arith.constant 1.000000e+00 : f32
    %86 = vector.broadcast %cst_27 : f32 to vector<2x8x96xf32>
    %87 = arith.addf %86, %85 : vector<2x8x96xf32>
    %88 = arith.divf %86, %87 : vector<2x8x96xf32>
    %89 = vector.extract_strided_slice %80 {offsets = [0, 0, 96], sizes = [2, 8, 96], strides = [1, 1, 1]} : vector<2x8x192xf32> to vector<2x8x96xf32>
    %90 = vector.broadcast %74 : vector<2x1x96xf32> to vector<2x8x96xf32>
    %91 = arith.addf %90, %89 : vector<2x8x96xf32>
    %cst_28 = arith.constant 0.000000e+00 : f32
    %92 = vector.broadcast %cst_28 : f32 to vector<2x8x96xf32>
    %93 = arith.maximumf %91, %92 : vector<2x8x96xf32>
    %cst_29 = arith.constant 1.000000e+00 : f32
    %94 = vector.broadcast %cst_29 : f32 to vector<2x8x96xf32>
    %95 = arith.subf %94, %88 : vector<2x8x96xf32>
    %96 = arith.mulf %95, %16 : vector<2x8x96xf32>
    %97 = arith.mulf %88, %93 : vector<2x8x96xf32>
    %98 = arith.addf %96, %97 : vector<2x8x96xf32>
    %99 = vector.extract_strided_slice %2 {offsets = [4, 0], sizes = [1, 96], strides = [1, 1]} : vector<8x96xf32> to vector<1x96xf32>
    %100 = vector.extract_strided_slice %2 {offsets = [5, 0], sizes = [1, 96], strides = [1, 1]} : vector<8x96xf32> to vector<1x96xf32>
    %cst_30 = arith.constant dense<0.000000e+00> : vector<2x8xf32>
    %101 = vector.multi_reduction <add>, %98, %cst_30 [2] : vector<2x8x96xf32> to vector<2x8xf32>
    %102 = vector.shape_cast %101 : vector<2x8xf32> to vector<2x8x1xf32>
    %cst_31 = arith.constant 9.600000e+01 : f32
    %103 = vector.broadcast %cst_31 : f32 to vector<2x8x1xf32>
    %104 = arith.divf %102, %103 : vector<2x8x1xf32>
    %105 = vector.broadcast %104 : vector<2x8x1xf32> to vector<2x8x96xf32>
    %106 = arith.subf %98, %105 : vector<2x8x96xf32>
    %107 = arith.mulf %106, %106 : vector<2x8x96xf32>
    %cst_32 = arith.constant dense<0.000000e+00> : vector<2x8xf32>
    %108 = vector.multi_reduction <add>, %107, %cst_32 [2] : vector<2x8x96xf32> to vector<2x8xf32>
    %109 = vector.shape_cast %108 : vector<2x8xf32> to vector<2x8x1xf32>
    %cst_33 = arith.constant 9.600000e+01 : f32
    %110 = vector.broadcast %cst_33 : f32 to vector<2x8x1xf32>
    %111 = arith.divf %109, %110 : vector<2x8x1xf32>
    %112 = vector.broadcast %104 : vector<2x8x1xf32> to vector<2x8x96xf32>
    %113 = arith.subf %98, %112 : vector<2x8x96xf32>
    %cst_34 = arith.constant 9.99999996E-13 : f32
    %114 = vector.broadcast %cst_34 : f32 to vector<2x8x1xf32>
    %115 = arith.addf %111, %114 : vector<2x8x1xf32>
    %116 = math.rsqrt %115 : vector<2x8x1xf32>
    %117 = vector.broadcast %116 : vector<2x8x1xf32> to vector<2x8x96xf32>
    %118 = arith.mulf %113, %117 : vector<2x8x96xf32>
    %119 = vector.shape_cast %99 : vector<1x96xf32> to vector<1x1x96xf32>
    %120 = vector.broadcast %119 : vector<1x1x96xf32> to vector<2x8x96xf32>
    %121 = arith.mulf %120, %118 : vector<2x8x96xf32>
    %122 = vector.shape_cast %100 : vector<1x96xf32> to vector<1x1x96xf32>
    %123 = vector.broadcast %122 : vector<1x1x96xf32> to vector<2x8x96xf32>
    %124 = arith.addf %121, %123 : vector<2x8x96xf32>
    %125 = vector.shape_cast %124 : vector<2x8x96xf32> to vector<16x96xf32>
    %c0_35 = arith.constant 0 : index
    %c0_36 = arith.constant 0 : index
    %126 = vector.load %arg7[%c0_35, %c0_36] : memref<96x96xf32, #tpu.memory_space<vmem>>, vector<96x96xf32>
    %cst_37 = arith.constant dense<0.000000e+00> : vector<16x96xf32>
    %127 = tpu.matmul %125, %126, %cst_37 {dimension_numbers = #tpu.dot_dimension_numbers<[1], [0], [0], [1], [0, 0, 1, 1], [], []>} : vector<16x96xf32>, vector<96x96xf32>, vector<16x96xf32> -> vector<16x96xf32>
    %c0_38 = arith.constant 0 : index
    %c0_39 = arith.constant 0 : index
    %128 = vector.load %arg8[%c0_38, %c0_39] : memref<1x96xf32, #tpu.memory_space<vmem>>, vector<1x96xf32>
    %129 = vector.broadcast %128 : vector<1x96xf32> to vector<16x96xf32>
    %130 = arith.addf %127, %129 : vector<16x96xf32>
    %131 = vector.shape_cast %130 : vector<16x96xf32> to vector<2x8x96xf32>
    %cst_40 = arith.constant dense<0.000000e+00> : vector<2x8x8xf32>
    %132 = tpu.matmul %131, %131, %cst_40 {dimension_numbers = #tpu.dot_dimension_numbers<[2], [2], [1], [1], [0, 0, 0, 1, 1, 1], [0], [0]>} : vector<2x8x96xf32>, vector<2x8x96xf32>, vector<2x8x8xf32> -> vector<2x8x8xf32>
    %cst_41 = arith.constant 0.102062076 : f32
    %133 = vector.broadcast %cst_41 : f32 to vector<2x8x8xf32>
    %134 = arith.mulf %132, %133 : vector<2x8x8xf32>
    %cst_42 = arith.constant dense<0xFF800000> : vector<2x8xf32>
    %135 = vector.multi_reduction <maximumf>, %134, %cst_42 [2] : vector<2x8x8xf32> to vector<2x8xf32>
    %136 = vector.shape_cast %135 : vector<2x8xf32> to vector<2x8x1xf32>
    %137 = vector.broadcast %136 : vector<2x8x1xf32> to vector<2x8x8xf32>
    %138 = arith.subf %134, %137 : vector<2x8x8xf32>
    %139 = math.exp %138 : vector<2x8x8xf32>
    %cst_43 = arith.constant dense<0.000000e+00> : vector<2x8xf32>
    %140 = vector.multi_reduction <add>, %139, %cst_43 [2] : vector<2x8x8xf32> to vector<2x8xf32>
    %141 = vector.shape_cast %140 : vector<2x8xf32> to vector<2x8x1xf32>
    %142 = tpu.reciprocal %141 : vector<2x8x1xf32> -> vector<2x8x1xf32>
    %143 = vector.broadcast %142 : vector<2x8x1xf32> to vector<2x8x8xf32>
    %144 = arith.mulf %139, %143 : vector<2x8x8xf32>
    %cst_44 = arith.constant dense<0.000000e+00> : vector<2x8x96xf32>
    %145 = tpu.matmul %144, %131, %cst_44 {dimension_numbers = #tpu.dot_dimension_numbers<[2], [1], [1], [2], [0, 0, 0, 1, 1, 2], [0], [0]>} : vector<2x8x8xf32>, vector<2x8x96xf32>, vector<2x8x96xf32> -> vector<2x8x96xf32>
    %146 = vector.extract_strided_slice %2 {offsets = [6, 0], sizes = [1, 96], strides = [1, 1]} : vector<8x96xf32> to vector<1x96xf32>
    %147 = vector.extract_strided_slice %2 {offsets = [7, 0], sizes = [1, 96], strides = [1, 1]} : vector<8x96xf32> to vector<1x96xf32>
    %cst_45 = arith.constant dense<0.000000e+00> : vector<2x8xf32>
    %148 = vector.multi_reduction <add>, %145, %cst_45 [2] : vector<2x8x96xf32> to vector<2x8xf32>
    %149 = vector.shape_cast %148 : vector<2x8xf32> to vector<2x8x1xf32>
    %cst_46 = arith.constant 9.600000e+01 : f32
    %150 = vector.broadcast %cst_46 : f32 to vector<2x8x1xf32>
    %151 = arith.divf %149, %150 : vector<2x8x1xf32>
    %152 = vector.broadcast %151 : vector<2x8x1xf32> to vector<2x8x96xf32>
    %153 = arith.subf %145, %152 : vector<2x8x96xf32>
    %154 = arith.mulf %153, %153 : vector<2x8x96xf32>
    %cst_47 = arith.constant dense<0.000000e+00> : vector<2x8xf32>
    %155 = vector.multi_reduction <add>, %154, %cst_47 [2] : vector<2x8x96xf32> to vector<2x8xf32>
    %156 = vector.shape_cast %155 : vector<2x8xf32> to vector<2x8x1xf32>
    %cst_48 = arith.constant 9.600000e+01 : f32
    %157 = vector.broadcast %cst_48 : f32 to vector<2x8x1xf32>
    %158 = arith.divf %156, %157 : vector<2x8x1xf32>
    %159 = vector.broadcast %151 : vector<2x8x1xf32> to vector<2x8x96xf32>
    %160 = arith.subf %145, %159 : vector<2x8x96xf32>
    %cst_49 = arith.constant 9.99999996E-13 : f32
    %161 = vector.broadcast %cst_49 : f32 to vector<2x8x1xf32>
    %162 = arith.addf %158, %161 : vector<2x8x1xf32>
    %163 = math.rsqrt %162 : vector<2x8x1xf32>
    %164 = vector.broadcast %163 : vector<2x8x1xf32> to vector<2x8x96xf32>
    %165 = arith.mulf %160, %164 : vector<2x8x96xf32>
    %166 = vector.shape_cast %146 : vector<1x96xf32> to vector<1x1x96xf32>
    %167 = vector.broadcast %166 : vector<1x1x96xf32> to vector<2x8x96xf32>
    %168 = arith.mulf %167, %165 : vector<2x8x96xf32>
    %169 = vector.shape_cast %147 : vector<1x96xf32> to vector<1x1x96xf32>
    %170 = vector.broadcast %169 : vector<1x1x96xf32> to vector<2x8x96xf32>
    %171 = arith.addf %168, %170 : vector<2x8x96xf32>
    %cst_50 = arith.constant dense<0xFF800000> : vector<2x96xf32>
    %172 = vector.multi_reduction <maximumf>, %171, %cst_50 [1] : vector<2x8x96xf32> to vector<2x96xf32>
    %173 = vector.shape_cast %172 : vector<2x96xf32> to vector<2x1x96xf32>
    %174 = vector.broadcast %173 : vector<2x1x96xf32> to vector<2x8x96xf32>
    %175 = arith.subf %171, %174 : vector<2x8x96xf32>
    %176 = math.exp %175 : vector<2x8x96xf32>
    %cst_51 = arith.constant dense<0.000000e+00> : vector<2x96xf32>
    %177 = vector.multi_reduction <add>, %176, %cst_51 [1] : vector<2x8x96xf32> to vector<2x96xf32>
    %178 = vector.shape_cast %177 : vector<2x96xf32> to vector<2x1x96xf32>
    %179 = tpu.reciprocal %178 : vector<2x1x96xf32> -> vector<2x1x96xf32>
    %180 = vector.broadcast %179 : vector<2x1x96xf32> to vector<2x8x96xf32>
    %181 = arith.mulf %176, %180 : vector<2x8x96xf32>
    %c0_52 = arith.constant 0 : index
    %c0_53 = arith.constant 0 : index
    %c0_54 = arith.constant 0 : index
    %182 = vector.load %arg10[%c0_52, %c0_53, %c0_54] : memref<2x8x160xf32, #tpu.memory_space<vmem>>, vector<2x8x96xf32>
    tpu.vector_store %arg10[%c0_52, %c0_53, %c0_54], %181 {strides = array<i32>} : memref<2x8x160xf32, #tpu.memory_space<vmem>>, vector<2x8x96xf32>,
    %183 = vector.extract_strided_slice %171 {offsets = [0, 0, 32], sizes = [2, 8, 32], strides = [1, 1, 1]} : vector<2x8x96xf32> to vector<2x8x32xf32>
    %c0_55 = arith.constant 0 : index
    %c0_56 = arith.constant 0 : index
    %c96 = arith.constant 96 : index
    %184 = vector.load %arg10[%c0_55, %c0_56, %c96] : memref<2x8x160xf32, #tpu.memory_space<vmem>>, vector<2x8x32xf32>
    tpu.vector_store %arg10[%c0_55, %c0_56, %c96], %183 {strides = array<i32>} : memref<2x8x160xf32, #tpu.memory_space<vmem>>, vector<2x8x32xf32>,
    %185 = vector.extract_strided_slice %171 {offsets = [0, 0, 64], sizes = [2, 8, 32], strides = [1, 1, 1]} : vector<2x8x96xf32> to vector<2x8x32xf32>
    %186 = math.absf %185 : vector<2x8x32xf32>
    %c0_57 = arith.constant 0 : index
    %c0_58 = arith.constant 0 : index
    %c128 = arith.constant 128 : index
    %187 = vector.load %arg10[%c0_57, %c0_58, %c128] : memref<2x8x160xf32, #tpu.memory_space<vmem>>, vector<2x8x32xf32>
    tpu.vector_store %arg10[%c0_57, %c0_58, %c128], %186 {strides = array<i32>} : memref<2x8x160xf32, #tpu.memory_space<vmem>>, vector<2x8x32xf32>,
    return
  }
  func.func @transform_0(%arg0: i32) -> (i32, i32, i32) {
    %c0_i32 = arith.constant 0 : i32
    %c0_i32_0 = arith.constant 0 : i32
    %c0_i32_1 = arith.constant 0 : i32
    %c0_i32_2 = arith.constant 0 : i32
    return %c0_i32, %c0_i32_0, %c0_i32_1 : i32, i32, i32
  }
  func.func @transform_1(%arg0: i32) -> (i32, i32) {
    %c0_i32 = arith.constant 0 : i32
    %c0_i32_0 = arith.constant 0 : i32
    %c0_i32_1 = arith.constant 0 : i32
    return %c0_i32, %c0_i32_0 : i32, i32
  }
  func.func @transform_2(%arg0: i32) -> (i32, i32) {
    %c0_i32 = arith.constant 0 : i32
    %c0_i32_0 = arith.constant 0 : i32
    %c0_i32_1 = arith.constant 0 : i32
    return %c0_i32, %c0_i32_0 : i32, i32
  }
  func.func @transform_3(%arg0: i32) -> (i32, i32) {
    %c0_i32 = arith.constant 0 : i32
    %c0_i32_0 = arith.constant 0 : i32
    %c0_i32_1 = arith.constant 0 : i32
    return %c0_i32, %c0_i32_0 : i32, i32
  }
  func.func @transform_4(%arg0: i32) -> (i32, i32) {
    %c0_i32 = arith.constant 0 : i32
    %c0_i32_0 = arith.constant 0 : i32
    %c0_i32_1 = arith.constant 0 : i32
    return %c0_i32, %c0_i32_0 : i32, i32
  }
  func.func @transform_5(%arg0: i32) -> (i32, i32) {
    %c0_i32 = arith.constant 0 : i32
    %c0_i32_0 = arith.constant 0 : i32
    %c0_i32_1 = arith.constant 0 : i32
    return %c0_i32, %c0_i32_0 : i32, i32
  }
  func.func @transform_6(%arg0: i32) -> (i32, i32) {
    %c0_i32 = arith.constant 0 : i32
    %c0_i32_0 = arith.constant 0 : i32
    %c0_i32_1 = arith.constant 0 : i32
    return %c0_i32, %c0_i32_0 : i32, i32
  }
  func.func @transform_7(%arg0: i32) -> (i32, i32) {
    %c0_i32 = arith.constant 0 : i32
    %c0_i32_0 = arith.constant 0 : i32
    %c0_i32_1 = arith.constant 0 : i32
    return %c0_i32, %c0_i32_0 : i32, i32
  }
  func.func @transform_8(%arg0: i32) -> (i32, i32) {
    %c0_i32 = arith.constant 0 : i32
    %c0_i32_0 = arith.constant 0 : i32
    %c0_i32_1 = arith.constant 0 : i32
    return %c0_i32, %c0_i32_0 : i32, i32
  }
  func.func @transform_9(%arg0: i32) -> (i32, i32, i32) {
    %c0_i32 = arith.constant 0 : i32
    %c0_i32_0 = arith.constant 0 : i32
    %c0_i32_1 = arith.constant 0 : i32
    %c0_i32_2 = arith.constant 0 : i32
    return %c0_i32, %c0_i32_0, %c0_i32_1 : i32, i32, i32
  }
}

</mosaic_0001>

<bundles_post_ra>
// kernel: tpu_custom_call.1
= control target key start
LH: loop header
LB: loop body
LE: loop exit
PB: predicated region body
PF: predicated region fallthrough
CT: control target
= control target key end

     0   :  { %14 = vsyncpa [#allocation3], 0  ;;  %s1402_s0 = inlined_call_operand.hbm [shape: f32[2,8,96], index: 0, kind: input, shape index: {}]   ;;  %s1403_s1 = inlined_call_operand.hbm [shape: f32[2,64], index: 1, kind: input, shape index: {}]   ;;  %s1404_s2 = inlined_call_operand.hbm [shape: f32[64,192], index: 2, kind: input, shape index: {}]   ;;  %s1405_s3 = inlined_call_operand.vmem [shape: f32[1,192], index: 3, kind: input, shape index: {}]   ;;  %s1406_s4 = inlined_call_operand.hbm [shape: f32[96,192], index: 4, kind: input, shape index: {}]   ;;  %s1407_s5 = inlined_call_operand.vmem [shape: f32[1,192], index: 5, kind: input, shape index: {}]   ;;  %s1408_s6 = inlined_call_operand.hbm [shape: f32[96,96], index: 6, kind: input, shape index: {}]   ;;  %s1409_s7 = inlined_call_operand.vmem [shape: f32[1,96], index: 7, kind: input, shape index: {}]   ;;  %s1410_s8 = inlined_call_operand.hbm [shape: f32[8,96], index: 8, kind: input, shape index: {}]   ;;  %s1411_s9 = inlined_call_operand.hbm [shape: f32[2,8,160], index: 9, kind: output, shape index: {}]  }
   0x1   :  { %15 = vsyncpa [#allocation6], 0 }
   0x2   :  { %16 = vsyncpa [#allocation9], 0 }
   0x3   :  { %17 = vsyncpa [#allocation12], 0  ;;  %s37_s11 = sshll.u32 %s1403_s1, 4  ;;  %s38_s11 = int_to_ptr.hbm [resolvable:$true] %s37_s11 }
   0x4   :  { %18 = vsyncpa [#allocation4], 0  ;;  %s1167_s12 = smov [#allocation5]   ;;  %s62_s16 = sshll.u32 %s1406_s4, 4  ;;  %s63_s16 = int_to_ptr.hbm [resolvable:$true] %s62_s16 }
   0x5   :  { %s39_s13 = sshll.u32 %s1167_s12, 4  ;;  %s1168_s17 = smov [#allocation8]   ;;  %s40_s13 = int_to_ptr.vmem [resolvable:$true] %s39_s13 }
   0x6   :  { %42 = dma.hbm_to_vmem [thread:$0]  %s38_s11, 32, %s40_s13, [#allocation6]  }
   0x7   :  { %s64_s18 = sshll.u32 %s1168_s17, 4  ;;  %s23_s21 = sshll.u32 %s1402_s0, 4  ;;  %s65_s18 = int_to_ptr.vmem [resolvable:$true] %s64_s18  ;;  %s24_s21 = int_to_ptr.hbm [resolvable:$true] %s23_s21 }
   0x8   :  { %s1169_s1 = smov 256   ;;  %s1170_s22 = smov 16  }
   0x9   :  { %70 = dma.hbm_to_vmem [thread:$0]  %s63_s16, 3072, %s65_s18, [#allocation9], %s1169_s1, %s1169_s1, %s1170_s22  }
   0xa   :  { %s1171_s23 = smov [#allocation2]   ;;  %s47_s26 = sshll.u32 %s1404_s2, 4  ;;  %s48_s26 = int_to_ptr.hbm [resolvable:$true] %s47_s26 }
   0xb   :  { %s25_s24 = sshll.u32 %s1171_s23, 4  ;;  %s1172_s27 = smov 128   ;;  %s26_s24 = int_to_ptr.vmem [resolvable:$true] %s25_s24 }
   0xc   :  { %s1173_s28 = smov 8   ;;  %s1174_s0 = smov [#allocation7]  }
   0xd   :  { %31 = dma.hbm_to_vmem [thread:$0]  %s24_s21, 256, %s26_s24, [#allocation3], %s1172_s27, %s1172_s27, %s1173_s28  }
   0xe   :  { %s49_s29 = sshll.u32 %s1174_s0, 4  ;;  %s77_s11 = sshll.u32 %s1408_s6, 4  ;;  %s50_s29 = int_to_ptr.vmem [resolvable:$true] %s49_s29  ;;  %s78_s11 = int_to_ptr.hbm [resolvable:$true] %s77_s11 }
   0xf   :  { %55 = dma.hbm_to_vmem [thread:$0]  %s48_s26, 2048, %s50_s29, [#allocation6], %s1169_s1, %s1169_s1, %s1170_s22  }
  0x10   :  { %s93_s2 = sshll.u32 %s1410_s8, 4  ;;  %s1175_s14 = smov [#allocation10]   ;;  %s94_s2 = int_to_ptr.hbm [resolvable:$true] %s93_s2 }
  0x11   :  { %s79_s15 = sshll.u32 %s1175_s14, 4  ;;  %s1176_s16 = smov [#allocation11]   ;;  %s80_s15 = int_to_ptr.vmem [resolvable:$true] %s79_s15 }
  0x12   :  { %85 = dma.hbm_to_vmem [thread:$0]  %s78_s11, 1536, %s80_s15, [#allocation9], %s1172_s27, %s1172_s27, %s1173_s28  }
  0x13   :  { %s95_s17 = sshll.u32 %s1176_s16, 4  ;;  %s96_s17 = int_to_ptr.vmem [resolvable:$true] %s95_s17 }
  0x14   :  { %98 = dma.hbm_to_vmem [thread:$0]  %s94_s2, 128, %s96_s17, [#allocation12]  }
  0x15   :  { %1157 = dma.done.wait [#allocation3], 256  }
  0x16   :  { %1158 = vsyncadd [#allocation3], 4294967040 }
  0x17   :  { %1159 = dma.done.wait [#allocation6], 2080  }
  0x18   :  { %1160 = vsyncadd [#allocation6], 4294965216 }
  0x19   :  { %1161 = dma.done.wait [#allocation9], 4608  }
  0x1a   :  { %1162 = vsyncadd [#allocation9], 4294962688 }
  0x1b   :  { %1163 = dma.done.wait [#allocation12], 128  }
  0x1c   :  { %1164 = vsyncadd [#allocation12], 4294967168  ;;  %v211_v0 = vld [vmem:[#allocation7 + $0x70] sm:$0xff]  ;;  %v209_v1 = vld [vmem:[#allocation7 + $0x60] sm:$0xff]  ;;  %vm219_vm0 = vcmask 523264   ;;  %s1177_s18 = smov 32  }
  0x1d   :  { %231 = vmatpush.msra.mxu0 %v211_v0  ;;  %v212_v2 = vld [vmem:[#allocation7 + $0x78] sm:$0xff]  ;;  %v207_v3 = vld [vmem:[#allocation7 + $0x50] sm:$0xff]  ;;  %v210_v4 = vld [vmem:[#allocation7 + $0x68] sm:$0xff]  ;;  %vm305_vm1 = vcmask 261120   ;;  %vm263_vm2 = vcmask 779264   ;;  %v1178_v28 = vmov 96.0  }
  0x1e   :  { %251 = vmatpush.msra.mxu1 %v212_v2  ;;  %v208_v5 = vld [vmem:[#allocation7 + $0x58] sm:$0xff]  ;;  %v205_v6 = vld [vmem:[#allocation7 + $0x40] sm:$0xff]  ;;  %v206_v7 = vld [vmem:[#allocation7 + $0x48] sm:$0xff]  ;;  %943 = vrcp.f32 %v1178_v28  ;;  %vm130_vm4 = vcmask 785408   ;;  %s1180_s21 = smov [#allocation13]   ;;  %s896_s4 = sshll.u32 %s1411_s9, 4  ;;  %s897_s4 = int_to_ptr.hbm [resolvable:$true] %s896_s4 }
  0x1f   :  { %232 = vmatpush.msra.mxu0 %v209_v1  ;;  %v203_v8 = vld [vmem:[#allocation7 + $0x30] sm:$0xff]  ;;  %v204_v9 = vld [vmem:[#allocation7 + $0x38] sm:$0xff]  ;;  %v201_v10 = vld [vmem:[#allocation7 + $0x20] sm:$0xff]  ;;  %s894_s23 = sshll.u32 %s1180_s21, 4  ;;  %s895_s23 = int_to_ptr.vmem [resolvable:$true] %s894_s23 }
  0x20   :  { %252 = vmatpush.msra.mxu1 %v210_v4  ;;  %v202_v11 = vld [vmem:[#allocation7 + $0x28] sm:$0xff]  ;;  %v199_v12 = vld [vmem:[#allocation7 + $0x10] sm:$0xff]  ;;  %v200_v13 = vld [vmem:[#allocation7 + $0x18] sm:$0xff] }
  0x21   :  { %233 = vmatpush.msra.mxu0 %v207_v3  ;;  %v197_v14 = vld [vmem:[#allocation7] sm:$0xff]  ;;  %v125_v15 = vld [vmem:[#allocation5] sm:$0x3]  ;;  %v198_v16 = vld [vmem:[#allocation7 + $0x8] sm:$0xff] }
  0x22   :  { %253 = vmatpush.msra.mxu1 %v208_v5  ;;  %v213_v17 = vld [vmem:[%s1405_s3] sm:$0x3]  ;;  %v378_v41 = vld [vmem:[#allocation8 + $0xb8] sm:$0xff] }
  0x23   :  { %234 = vmatpush.msra.mxu0 %v205_v6  ;;  %v215_v18 = vperm.slane %v213_v17, 0  ;;  %v216_v21 = vperm.slane %v213_v17, 1  ;;  %v376_v42 = vld [vmem:[#allocation8 + $0xa8] sm:$0xff]  ;;  %418 = vmatpush.msra.mxu3 %v378_v41  ;;  %v374_v43 = vld [vmem:[#allocation8 + $0x98] sm:$0xff]  ;;  %v365_v41 = vld [vmem:[#allocation8 + $0x50] sm:$0xff] }
  0x24   :  { %254 = vmatpush.msra.mxu1 %v206_v7  ;;  %v944_v29 = vpop.eup %943  ;;  %v372_v44 = vld [vmem:[#allocation8 + $0x88] sm:$0xff]  ;;  %v1288_v57 = vld [vmem:[#allocation2 + $0x8] sm:$0xff] }
  0x25   :  { %235 = vmatpush.msra.mxu0 %v203_v8  ;;  %v268_v30 = vmul.f32 96.0, %v944_v29  ;;  %vm272_vm3 = vweird.f32 %v944_v29  ;;  %419 = vmatpush.msra.mxu3 %v376_v42  ;;  %v1279_v45 = vld [vmem:[#allocation2] sm:$0xff]  ;;  %v138_v59 = vsel %vm130_vm4, %v1288_v57, -inf }
  0x26   :  { %255 = vmatpush.msra.mxu1 %v204_v9  ;;  %v131_v46 = vsel %vm130_vm4, %v1279_v45, -inf  ;;  %v139_v61 = vrot.slane %v138_v59, 4  ;;  %v364_v17 = vld [vmem:[#allocation8 + $0x48] sm:$0xff] }
  0x27   :  { %236 = vmatpush.msra.mxu0 %v201_v10  ;;  %v269_v31 = vsub.f32 1.0, %v268_v30  ;;  %420 = vmatpush.msra.mxu3 %v374_v43  ;;  %v132_v47 = vrot.slane %v131_v46, 4  ;;  %v370_v10 = vld [vmem:[#allocation8 + $0x78] sm:$0xff]  ;;  %v360_v28 = vld [vmem:[#allocation8 + $0x28] sm:$0xff] }
  0x28   :  { %256 = vmatpush.msra.mxu1 %v202_v11  ;;  %v140_v63 = vmax.f32 %v138_v59, %v139_v61  ;;  %v368_v11 = vld [vmem:[#allocation8 + $0x68] sm:$0xff]  ;;  %v357_v59 = vld [vmem:[#allocation8 + $0x10] sm:$0xff] }
  0x29   :  { %237 = vmatpush.msra.mxu0 %v199_v12  ;;  %v270_v32 = vmul.f32 %v944_v29, %v269_v31  ;;  %421 = vmatpush.msra.mxu3 %v372_v44  ;;  %v133_v48 = vmax.f32 %v131_v46, %v132_v47  ;;  %v377_v12 = vld [vmem:[#allocation8 + $0xb0] sm:$0xff]  ;;  %v356_v43 = vld [vmem:[#allocation8 + $0x8] sm:$0xff]  ;;  %v363_v47 = vld [vmem:[#allocation8 + $0x40] sm:$0xff] }
  0x2a   :  { %257 = vmatpush.msra.mxu1 %v200_v13  ;;  %v141_v1 = vrot.slane %v140_v63, 2  ;;  %v366_v13 = vld [vmem:[#allocation8 + $0x58] sm:$0xff]  ;;  %395 = vmatpush.msra.mxu2 %v377_v12 }
  0x2b   :  { %238 = vmatpush.msra.mxu0 %v197_v14  ;;  %v271_v33 = vadd.f32 %v944_v29, %v270_v32  ;;  %v134_v49 = vrot.slane %v133_v48, 2  ;;  %422 = vmatpush.msra.mxu3 %v370_v10  ;;  %v375_v14 = vld [vmem:[#allocation8 + $0xa0] sm:$0xff] }
  0x2c   :  { %912 = vmatmul.msk.f32.vlgmr.msra.gmra.mxu0 %vm219_vm0, %v125_v15  ;;  %258 = vmatpush.msra.mxu1 %v198_v16  ;;  %v142_v3 = vmax.f32 %v140_v63, %v141_v1  ;;  %v373_v16 = vld [vmem:[#allocation8 + $0x90] sm:$0xff] }
  0x2d   :  { %913 = vmatmul.msk.f32.vlgmr.msra.gmra.mxu1 %vm219_vm0, %v125_v15  ;;  %v1265_v34 = vsel %vm272_vm3, %v944_v29, %v271_v33  ;;  %v135_v50 = vmax.f32 %v133_v48, %v134_v49  ;;  %423 = vmatpush.msra.mxu3 %v368_v11 }
  0x2e   :  { %v143_v5 = vrot.slane %v142_v3, 1  ;;  %396 = vmatpush.msra.mxu2 %v375_v14  ;;  %v379_v14 = vld [vmem:[%s1407_s5] sm:$0x3] }
  0x2f   :  { %v136_v51 = vrot.slane %v135_v50, 1  ;;  %424 = vmatpush.msra.mxu3 %v366_v13  ;;  %v381_v32 = vperm.slane %v379_v14, 0 }
  0x30   :  { %v144_v7 = vmax.f32 %v142_v3, %v143_v5  ;;  %397 = vmatpush.msra.mxu2 %v373_v16 }
  0x31   :  { %v137_v52 = vmax.f32 %v135_v50, %v136_v51  ;;  %425 = vmatpush.msra.mxu3 %v364_v17 }
  0x32   :  { %v146_v8 = vsub.f32 %v1288_v57, %v144_v7 }
  0x33   :  { %v145_v53 = vsub.f32 %v1279_v45, %v137_v52 }
  0x34   :  { %v149_v9 = vmul.f32 1.442695, %v146_v8 }
  0x35   :  { %v147_v54 = vmul.f32 1.442695, %v145_v53 }
  0x37   :  { %945 = vpow2.f32 %v147_v54  ;;  %v361_v54 = vld [vmem:[#allocation8 + $0x30] sm:$0xff] }
  0x3d   :  { %v1286_v56 = vpop.eup %945 }
  0x3e   :  { %v151_v58 = vsel %vm130_vm4, %v1286_v56, 0.0 }
  0x3f   :  { %v152_v60 = vrot.slane %v151_v58, 4 }
  0x41   :  { %v153_v62 = vadd.f32 %v152_v60, %v151_v58  ;;  %v359_v58 = vld [vmem:[#allocation8 + $0x20] sm:$0xff] }
  0x42   :  { %v355_v60 = vld [vmem:[#allocation8] sm:$0xff] }
  0x43   :  { %v154_v0 = vrot.slane %v153_v62, 2 }
  0x45   :  { %v155_v2 = vadd.f32 %v154_v0, %v153_v62 }
  0x47   :  { %v156_v4 = vrot.slane %v155_v2, 1 }
  0x49   :  { %v157_v6 = vadd.f32 %v156_v4, %v155_v2 }
  0x4b   :  { %947 = vrcp.f32 %v157_v6  ;;  %vm170_vm5 = vweird.f32 %v157_v6 }
  0x4c   :  { %949 = vpow2.f32 %v149_v9 }
  0x51   :  { %v948_v15 = vpop.eup %947 }
  0x52   :  { %vm171_vm6 = vweird.f32 %v948_v15 }
  0x53   :  { %vm1296_vm7 = vmor %vm170_vm5, %vm171_vm6 }
  0xa9   :  { %v240_v19 = vpop.f32.mrf.mxu0 }
  0xaa   :  { %v1258_v20 = vadd.f32 %v240_v19, %v215_v18  ;;  %v260_v22 = vpop.f32.mrf.mxu1  ;;  %v166_v18 = vmul.f32 %v948_v15, %v157_v6  ;;  %v371_v19 = vld [vmem:[#allocation8 + $0x80] sm:$0xff] }
  0xab   :  { %v261_v23 = vadd.f32 %v260_v22, %v216_v21  ;;  %v127_v21 = vlaneseq  ;;  %v176_v22 = vand.u32 2147483648, %v157_v6  ;;  %398 = vmatpush.msra.mxu2 %v371_v19 }
  0xac   :  { %301 = vrot.lane.b32.xlu0 %v1258_v20, %s1177_s18  ;;  %v264_v55 = vsel %vm263_vm2, %v1258_v20, 0.0 }
  0xad   :  { %v128_v31 = vand.u32 127, %v127_v21  ;;  %v177_v33 = vor.u32 1.1754944e-38, %v176_v22 }
  0xaf   :  { %vm129_vm9 = vcmp.lt.s32.totalorder %v128_v31, 32 }
  0xb4   :  { %303 = vrot.lane.b32.xlu0 %v261_v23, %s1177_s18 }
 0x11e   :  { %v302_v24 = vpop.permute.xlu0 %301 }
 0x126   :  { %v304_v25 = vpop.permute.xlu0 %303 }
 0x127   :  { %v306_v26 = vsel %vm305_vm1, %v302_v24, %v304_v25  ;;  %v167_v24 = vsub.f32 1.0, %v166_v18  ;;  %v174_v25 = vand.u32 2147483647, %v157_v6 }
 0x128   :  { %v308_v27 = vsel %vm263_vm2, %v306_v26, 0.0  ;;  %v950_v26 = vpop.eup %949 }
 0x129   :  { %309 = vadd.xlane.f32.xlu1 %v308_v27  ;;  %v369_v27 = vld [vmem:[#allocation8 + $0x70] sm:$0xff]  ;;  %v168_v29 = vmul.f32 %v948_v15, %v167_v24  ;;  %v158_v30 = vsel %vm130_vm4, %v950_v26, 0.0  ;;  %vm175_vm8 = vcmp.eq.f32.partialorder %v174_v25, 8.507059e+37 }
 0x12a   :  { %399 = vmatpush.msra.mxu2 %v369_v27 }
 0x19c   :  { %v310_v35 = vpop.xlane.xlu1 %309 }
 0x19d   :  { %v311_v36 = vmul.f32 %v310_v35, %v1265_v34  ;;  %v367_v35 = vld [vmem:[#allocation8 + $0x60] sm:$0xff] }
 0x19e   :  { %400 = vmatpush.msra.mxu2 %v367_v35 }
 0x19f   :  { %v1269_v37 = vsub.f32 %v1258_v20, %v311_v36  ;;  %v1271_v38 = vsub.f32 %v261_v23, %v311_v36  ;;  %v362_v23 = vld [vmem:[#allocation8 + $0x38] sm:$0xff]  ;;  %v159_v36 = vrot.slane %v158_v30, 4 }
 0x1a0   :  { %426 = vmatpush.msra.mxu3 %v362_v23  ;;  %401 = vmatpush.msra.mxu2 %v365_v41 }
 0x1a1   :  { %v315_v39 = vmul.f32 %v1271_v38, %v1271_v38  ;;  %v314_v40 = vmul.f32 %v1269_v37, %v1269_v37  ;;  %v160_v42 = vadd.f32 %v159_v36, %v158_v30 }
 0x1a2   :  { %427 = vmatpush.msra.mxu3 %v360_v28  ;;  %402 = vmatpush.msra.mxu2 %v363_v47 }
 0x1a3   :  { %320 = vrot.lane.b32.xlu2 %v315_v39, %s1177_s18  ;;  %318 = vrot.lane.b32.xlu1 %v314_v40, %s1177_s18  ;;  %v358_v39 = vld [vmem:[#allocation8 + $0x18] sm:$0xff]  ;;  %v169_v40 = vadd.f32 %v948_v15, %v168_v29  ;;  %v161_v48 = vrot.slane %v160_v42, 2 }
 0x1a4   :  { %428 = vmatpush.msra.mxu3 %v358_v39  ;;  %403 = vmatpush.msra.mxu2 %v361_v54 }
 0x1a5   :  { %v173_v44 = vsel %vm1296_vm7, %v948_v15, %v169_v40  ;;  %v162_v50 = vadd.f32 %v161_v48, %v160_v42  ;;  %v382_v15 = vperm.slane %v379_v14, 1  ;;  %v1337_v48 = vld [vmem:[#allocation11] sm:$0xff] }
 0x1a6   :  { %v178_v46 = vsel %vm175_vm8, %v177_v33, %v173_v44  ;;  %429 = vmatpush.msra.mxu3 %v356_v43  ;;  %404 = vmatpush.msra.mxu2 %v359_v58 }
 0x1a7   :  { %v193_v49 = vmul.f32 %v1286_v56, %v178_v46  ;;  %v163_v52 = vrot.slane %v162_v50, 1 }
 0x1a8   :  { %405 = vmatpush.msra.mxu2 %v357_v59 }
 0x1a9   :  { %v1305_v51 = vsel %vm129_vm9, %v193_v49, %v1279_v45  ;;  %v164_v53 = vadd.f32 %v163_v52, %v162_v50  ;;  %v293_v50 = vperm.slane %v1337_v48, 0 }
 0x1aa   :  { %916 = vmatmul.msk.f32.vlgmr.msra.gmra.mxu3 %vm130_vm4, %v1305_v51  ;;  %406 = vmatpush.msra.mxu2 %v355_v60 }
 0x1ab   :  { %951 = vrcp.f32 %v164_v53  ;;  %v190_v61 = vand.u32 2147483648, %v164_v53  ;;  %vm184_vm10 = vweird.f32 %v164_v53  ;;  %v188_v45 = vand.u32 2147483647, %v164_v53  ;;  %914 = vmatmul.msk.f32.vlgmr.msra.gmra.mxu2 %vm130_vm4, %v1305_v51 }
 0x1ad   :  { %v191_v0 = vor.u32 1.1754944e-38, %v190_v61  ;;  %vm189_vm13 = vcmp.eq.f32.partialorder %v188_v45, 8.507059e+37 }
 0x1cc   :  { %265 = vadd.xlane.f32.xlu2 %v264_v55  ;;  %v952_v55 = vpop.eup %951 }
 0x1cd   :  { %v180_v56 = vmul.f32 %v952_v55, %v164_v53  ;;  %vm185_vm11 = vweird.f32 %v952_v55  ;;  %v295_v53 = vperm.slane %v1337_v48, 1 }
 0x1ce   :  { %vm186_vm12 = vmor %vm184_vm10, %vm185_vm11 }
 0x1cf   :  { %v181_v62 = vsub.f32 1.0, %v180_v56 }
 0x1d1   :  { %v182_v63 = vmul.f32 %v952_v55, %v181_v62 }
 0x1d3   :  { %v183_v1 = vadd.f32 %v952_v55, %v182_v63 }
 0x1d5   :  { %v187_v2 = vsel %vm186_vm12, %v952_v55, %v183_v1 }
 0x1d6   :  { %v192_v3 = vsel %vm189_vm13, %v191_v0, %v187_v2 }
 0x1d7   :  { %v194_v4 = vmul.f32 %v950_v26, %v192_v3 }
 0x1d9   :  { %v1313_v5 = vsel %vm129_vm9, %v194_v4, %v1288_v57 }
 0x1da   :  { %915 = vmatmul.msk.f32.gmra.mxu2 %vm130_vm4, %v1313_v5  ;;  %917 = vmatmul.msk.f32.gmra.mxu3 %vm130_vm4, %v1313_v5 }
 0x1fd   :  { %v321_v6 = vpop.permute.xlu2 %320 }
 0x215   :  { %v319_v7 = vpop.permute.xlu1 %318 }
 0x216   :  { %v322_v8 = vsel %vm305_vm1, %v319_v7, %v321_v6 }
 0x217   :  { %v324_v9 = vsel %vm263_vm2, %v322_v8, 0.0 }
 0x218   :  { %325 = vadd.xlane.f32.xlu0 %v324_v9 }
 0x22d   :  { %v431_v16 = vpop.f32.mrf.mxu3 }
 0x22e   :  { %v432_v17 = vadd.f32 %v431_v16, %v382_v15  ;;  %v408_v25 = vpop.f32.mrf.mxu2  ;;  %v351_v16 = vperm.slane %v1337_v48, 3 }
 0x22f   :  { %v409_v35 = vadd.f32 %v408_v25, %v381_v32 }
 0x23f   :  { %v266_v10 = vpop.xlane.xlu2 %265 }
 0x240   :  { %v274_v11 = vmul.f32 %v1265_v34, %v266_v10 }
 0x242   :  { %v275_v12 = vsub.f32 %v1258_v20, %v274_v11 }
 0x244   :  { %v276_v57 = vmul.f32 %v275_v12, %v275_v12 }
 0x246   :  { %v277_v13 = vsel %vm263_vm2, %v276_v57, 0.0 }
 0x247   :  { %278 = vadd.xlane.f32.xlu1 %v277_v13  ;;  %v341_v13 = vperm.slane %v1337_v48, 2 }
 0x25d   :  { %v411_v31 = vpop.f32.mrf.mxu2  ;;  %v434_v36 = vpop.f32.mrf.mxu3 }
 0x25e   :  { %v412_v33 = vadd.f32 %v411_v31, %v381_v32  ;;  %v435_v39 = vadd.f32 %v434_v36, %v382_v15 }
 0x260   :  { %491 = vrot.lane.b32.xlu1 %v432_v17, %s1177_s18 }
 0x28b   :  { %v326_v18 = vpop.xlane.xlu0 %325 }
 0x28c   :  { %v327_v19 = vmul.f32 %v326_v18, %v1265_v34 }
 0x28e   :  { %v328_v21 = vadd.f32 1e-12, %v327_v19 }
 0x290   :  { %953 = vrsqrt.f32 %v328_v21  ;;  %vm335_vm15 = vweird.f32 %v328_v21 }
 0x296   :  { %v954_v22 = vpop.eup %953 }
 0x297   :  { %v330_v20 = vmul.f32 %v954_v22, %v328_v21  ;;  %vm336_vm14 = vweird.f32 %v954_v22 }
 0x298   :  { %vm337_vm0 = vmor %vm335_vm15, %vm336_vm14 }
 0x299   :  { %v331_v23 = vmul.f32 %v954_v22, %v330_v20 }
 0x29b   :  { %v332_v24 = vmul.f32 0.5, %v331_v23 }
 0x29d   :  { %v333_v26 = vsub.f32 1.5, %v332_v24 }
 0x29f   :  { %v334_v27 = vmul.f32 %v954_v22, %v333_v26 }
 0x2a1   :  { %v338_v28 = vsel %vm337_vm0, %v954_v22, %v334_v27 }
 0x2a2   :  { %v340_v29 = vmul.f32 %v338_v28, %v1271_v38  ;;  %v339_v30 = vmul.f32 %v338_v28, %v1269_v37 }
 0x2a4   :  { %346 = vrot.lane.b32.xlu0 %v340_v29, %s1177_s18  ;;  %344 = vrot.lane.b32.xlu2 %v339_v30, %s1177_s18 }
 0x2ac   :  { %493 = vrot.lane.b32.xlu0 %v412_v33, %s1177_s18  ;;  %489 = vrot.lane.b32.xlu2 %v409_v35, %s1177_s18 }
 0x2b4   :  { %495 = vrot.lane.b32.xlu2 %v435_v39, %s1177_s18 }
 0x2ba   :  { %v279_v40 = vpop.xlane.xlu1 %278 }
 0x2bb   :  { %v280_v38 = vmul.f32 %v279_v40, %v1265_v34 }
 0x2bd   :  { %v281_v37 = vadd.f32 1e-12, %v280_v38 }
 0x2bf   :  { %955 = vrsqrt.f32 %v281_v37  ;;  %vm288_vm3 = vweird.f32 %v281_v37 }
 0x2c5   :  { %v956_v41 = vpop.eup %955 }
 0x2c6   :  { %v283_v42 = vmul.f32 %v956_v41, %v281_v37  ;;  %vm289_vm2 = vweird.f32 %v956_v41 }
 0x2c7   :  { %vm290_vm5 = vmor %vm288_vm3, %vm289_vm2 }
 0x2c8   :  { %v284_v43 = vmul.f32 %v956_v41, %v283_v42 }
 0x2ca   :  { %v285_v44 = vmul.f32 0.5, %v284_v43 }
 0x2cc   :  { %v286_v46 = vsub.f32 1.5, %v285_v44 }
 0x2ce   :  { %v287_v47 = vmul.f32 %v956_v41, %v286_v46 }
 0x2d0   :  { %v291_v49 = vsel %vm290_vm5, %v956_v41, %v287_v47 }
 0x2d1   :  { %v292_v52 = vmul.f32 %v291_v49, %v275_v12 }
 0x2d2   :  { %v492_v26 = vpop.permute.xlu1 %491 }
 0x2d3   :  { %v294_v54 = vmul.f32 %v293_v50, %v292_v52 }
 0x2d5   :  { %v296_v55 = vadd.f32 %v295_v53, %v294_v54 }
 0x2d7   :  { %v298_v58 = vrot.slane %v296_v55, 1  ;;  %v437_v59 = vperm.slane %v296_v55, 0 }
 0x2d9   :  { %v438_v56 = vperm.slane %v298_v58, 0  ;;  %v441_v60 = vadd.f32 %v437_v59, %v409_v35 }
 0x2db   :  { %v442_v61 = vadd.f32 %v438_v56, %v412_v33  ;;  %v918_v62 = vmul.f32 -1.442695, %v441_v60 }
 0x2dd   :  { %v919_v45 = vmul.f32 -1.442695, %v442_v61  ;;  %957 = vpow2.f32 %v918_v62 }
 0x2df   :  { %959 = vpow2.f32 %v919_v45 }
 0x2e3   :  { %v958_v63 = vpop.eup %957 }
 0x2e4   :  { %v449_v1 = vadd.f32 1.0, %v958_v63 }
 0x2e5   :  { %v960_v0 = vpop.eup %959 }
 0x2e6   :  { %v450_v2 = vadd.f32 1.0, %v960_v0  ;;  %961 = vrcp.f32 %v449_v1  ;;  %vm456_vm7 = vweird.f32 %v449_v1  ;;  %v462_v15 = vand.u32 2147483648, %v449_v1 }
 0x2e7   :  { %v460_v18 = vand.u32 2147483647, %v449_v1 }
 0x2e8   :  { %963 = vrcp.f32 %v450_v2  ;;  %v477_v22 = vand.u32 2147483648, %v450_v2  ;;  %vm471_vm10 = vweird.f32 %v450_v2  ;;  %v475_v24 = vand.u32 2147483647, %v450_v2 }
 0x2e9   :  { %v463_v25 = vor.u32 1.1754944e-38, %v462_v15  ;;  %vm461_vm12 = vcmp.eq.f32.partialorder %v460_v18, 8.507059e+37 }
 0x2ea   :  { %v478_v30 = vor.u32 1.1754944e-38, %v477_v22  ;;  %vm476_vm13 = vcmp.eq.f32.partialorder %v475_v24, 8.507059e+37 }
 0x2ec   :  { %v962_v3 = vpop.eup %961 }
 0x2ed   :  { %v452_v6 = vmul.f32 %v962_v3, %v449_v1  ;;  %vm457_vm6 = vweird.f32 %v962_v3  ;;  %v574_v1 = vld [vmem:[#allocation10 + $0x58] sm:$0xff] }
 0x2ee   :  { %v964_v4 = vpop.eup %963  ;;  %vm458_vm9 = vmor %vm456_vm7, %vm457_vm6  ;;  %589 = vmatpush.msrb.mxu0 %v574_v1  ;;  %vm656_vm6 = vcmask 64512  }
 0x2ef   :  { %v467_v8 = vmul.f32 %v964_v4, %v450_v2  ;;  %v453_v9 = vsub.f32 1.0, %v452_v6  ;;  %vm472_vm8 = vweird.f32 %v964_v4  ;;  %v573_v2 = vld [vmem:[#allocation10 + $0x50] sm:$0xff]  ;;  %v570_v6 = vld [vmem:[#allocation10 + $0x38] sm:$0xff] }
 0x2f0   :  { %vm473_vm11 = vmor %vm471_vm10, %vm472_vm8  ;;  %590 = vmatpush.msrb.mxu0 %v573_v2 }
 0x2f1   :  { %v468_v10 = vsub.f32 1.0, %v467_v8  ;;  %v454_v11 = vmul.f32 %v962_v3, %v453_v9  ;;  %v568_v8 = vld [vmem:[#allocation10 + $0x28] sm:$0xff]  ;;  %v567_v9 = vld [vmem:[#allocation10 + $0x20] sm:$0xff] }
 0x2f3   :  { %v469_v12 = vmul.f32 %v964_v4, %v468_v10  ;;  %v455_v14 = vadd.f32 %v962_v3, %v454_v11  ;;  %v566_v10 = vld [vmem:[#allocation10 + $0x18] sm:$0xff]  ;;  %v565_v11 = vld [vmem:[#allocation10 + $0x10] sm:$0xff] }
 0x2f5   :  { %v470_v19 = vadd.f32 %v964_v4, %v469_v12  ;;  %v459_v23 = vsel %vm458_vm9, %v962_v3, %v455_v14  ;;  %v572_v3 = vld [vmem:[#allocation10 + $0x48] sm:$0xff] }
 0x2f6   :  { %v464_v29 = vsel %vm461_vm12, %v463_v25, %v459_v23  ;;  %591 = vmatpush.msrb.mxu0 %v572_v3  ;;  %v564_v12 = vld [vmem:[#allocation10 + $0x8] sm:$0xff] }
 0x2f7   :  { %v474_v28 = vsel %vm473_vm11, %v964_v4, %v470_v19  ;;  %v505_v37 = vsub.f32 1.0, %v464_v29  ;;  %v571_v4 = vld [vmem:[#allocation10 + $0x40] sm:$0xff] }
 0x2f8   :  { %v479_v36 = vsel %vm476_vm13, %v478_v30, %v474_v28  ;;  %592 = vmatpush.msrb.mxu0 %v571_v4  ;;  %v557_v30 = vperm.slane %v1337_v48, 4 }
 0x2f9   :  { %v506_v44 = vsub.f32 1.0, %v479_v36  ;;  %v507_v47 = vmul.f32 %v505_v37, %v1305_v51 }
 0x2fa   :  { %593 = vmatpush.msrb.mxu0 %v570_v6 }
 0x2fb   :  { %v508_v52 = vmul.f32 %v506_v44, %v1313_v5 }
 0x2fe   :  { %v345_v7 = vpop.permute.xlu2 %344 }
 0x306   :  { %v490_v57 = vpop.permute.xlu2 %489 }
 0x307   :  { %v497_v35 = vsel %vm305_vm1, %v490_v57, %v492_v26  ;;  %v563_v57 = vld [vmem:[#allocation10] sm:$0xff] }
 0x30e   :  { %v496_v33 = vpop.permute.xlu2 %495 }
 0x316   :  { %v347_v17 = vpop.permute.xlu0 %346 }
 0x317   :  { %v348_v21 = vsel %vm305_vm1, %v345_v7, %v347_v17  ;;  %v569_v7 = vld [vmem:[#allocation10 + $0x30] sm:$0xff] }
 0x318   :  { %v350_v20 = vmul.f32 %v348_v21, %v341_v13  ;;  %594 = vmatpush.msrb.mxu0 %v569_v7 }
 0x31a   :  { %v352_v27 = vadd.f32 %v351_v16, %v350_v20  ;;  %595 = vmatpush.msrb.mxu0 %v568_v8 }
 0x31c   :  { %v481_v31 = vperm.slane %v352_v27, 0  ;;  %v354_v32 = vrot.slane %v352_v27, 1  ;;  %596 = vmatpush.msrb.mxu0 %v567_v9 }
 0x31e   :  { %v494_v39 = vpop.permute.xlu0 %493  ;;  %v482_v40 = vperm.slane %v354_v32, 0  ;;  %v501_v38 = vadd.f32 %v497_v35, %v481_v31  ;;  %597 = vmatpush.msrb.mxu0 %v566_v10  ;;  %v560_v35 = vperm.slane %v1337_v48, 5 }
 0x31f   :  { %v498_v41 = vsel %vm305_vm1, %v494_v39, %v496_v33 }
 0x320   :  { %v502_v42 = vadd.f32 %v498_v41, %v482_v40  ;;  %v503_v43 = vmax.f32 %v501_v38, 0.0  ;;  %598 = vmatpush.msrb.mxu0 %v565_v11 }
 0x322   :  { %v504_v46 = vmax.f32 %v502_v42, 0.0  ;;  %v509_v49 = vmul.f32 %v503_v43, %v464_v29  ;;  %599 = vmatpush.msrb.mxu0 %v564_v12  ;;  %v942_v42 = vld [vmem:[%s1409_s7] ss:$0 sm:$0xff]  ;;  %s1179_s7 = smov 64  }
 0x324   :  { %v511_v50 = vadd.f32 %v509_v49, %v507_v47  ;;  %v510_v53 = vmul.f32 %v504_v46, %v479_v36  ;;  %600 = vmatpush.msrb.mxu0 %v563_v57 }
 0x326   :  { %v513_v54 = vsel %vm130_vm4, %v511_v50, 0.0  ;;  %v512_v55 = vadd.f32 %v510_v53, %v508_v52 }
 0x327   :  { %514 = vadd.xlane.f32.xlu0 %v513_v54 }
 0x328   :  { %v516_v58 = vsel %vm130_vm4, %v512_v55, 0.0 }
 0x329   :  { %517 = vadd.xlane.f32.xlu2 %v516_v58 }
 0x39a   :  { %v515_v59 = vpop.xlane.xlu0 %514 }
 0x39b   :  { %v519_v56 = vmul.f32 %v515_v59, %v1265_v34 }
 0x39c   :  { %v518_v60 = vpop.xlane.xlu2 %517 }
 0x39d   :  { %v521_v61 = vsub.f32 %v511_v50, %v519_v56  ;;  %v520_v62 = vmul.f32 %v518_v60, %v1265_v34 }
 0x39f   :  { %v1352_v51 = vsub.f32 %v512_v55, %v520_v62  ;;  %v523_v45 = vmul.f32 %v521_v61, %v521_v61 }
 0x3a1   :  { %v525_v5 = vsel %vm130_vm4, %v523_v45, 0.0  ;;  %v524_v63 = vmul.f32 %v1352_v51, %v1352_v51 }
 0x3a2   :  { %526 = vadd.xlane.f32.xlu1 %v525_v5 }
 0x3a3   :  { %v528_v0 = vsel %vm130_vm4, %v524_v63, 0.0 }
 0x3a4   :  { %529 = vadd.xlane.f32.xlu0 %v528_v0 }
 0x415   :  { %v527_v13 = vpop.xlane.xlu1 %526 }
 0x416   :  { %v531_v14 = vmul.f32 %v527_v13, %v1265_v34 }
 0x417   :  { %v530_v15 = vpop.xlane.xlu0 %529 }
 0x418   :  { %v533_v16 = vadd.f32 1e-12, %v531_v14  ;;  %v532_v17 = vmul.f32 %v530_v15, %v1265_v34 }
 0x41a   :  { %965 = vrsqrt.f32 %v533_v16  ;;  %v534_v18 = vadd.f32 1e-12, %v532_v17  ;;  %vm541_vm15 = vweird.f32 %v533_v16 }
 0x41c   :  { %967 = vrsqrt.f32 %v534_v18  ;;  %vm551_vm3 = vweird.f32 %v534_v18 }
 0x420   :  { %v966_v19 = vpop.eup %965 }
 0x421   :  { %v536_v21 = vmul.f32 %v966_v19, %v533_v16  ;;  %vm542_vm14 = vweird.f32 %v966_v19 }
 0x422   :  { %v968_v22 = vpop.eup %967  ;;  %vm543_vm2 = vmor %vm541_vm15, %vm542_vm14 }
 0x423   :  { %v537_v20 = vmul.f32 %v966_v19, %v536_v21  ;;  %v546_v23 = vmul.f32 %v968_v22, %v534_v18  ;;  %vm552_vm0 = vweird.f32 %v968_v22 }
 0x424   :  { %vm553_vm5 = vmor %vm551_vm3, %vm552_vm0 }
 0x425   :  { %v538_v24 = vmul.f32 0.5, %v537_v20  ;;  %v547_v25 = vmul.f32 %v968_v22, %v546_v23 }
 0x427   :  { %v539_v26 = vsub.f32 1.5, %v538_v24  ;;  %v548_v27 = vmul.f32 0.5, %v547_v25 }
 0x429   :  { %v540_v28 = vmul.f32 %v966_v19, %v539_v26  ;;  %v549_v29 = vsub.f32 1.5, %v548_v27 }
 0x42b   :  { %v544_v31 = vsel %vm543_vm2, %v966_v19, %v540_v28  ;;  %v550_v32 = vmul.f32 %v968_v22, %v549_v29 }
 0x42c   :  { %v555_v33 = vmul.f32 %v544_v31, %v521_v61 }
 0x42d   :  { %v554_v36 = vsel %vm553_vm5, %v968_v22, %v550_v32 }
 0x42e   :  { %v558_v39 = vmul.f32 %v557_v30, %v555_v33  ;;  %v556_v38 = vmul.f32 %v554_v36, %v1352_v51 }
 0x430   :  { %v561_v40 = vadd.f32 %v560_v35, %v558_v39  ;;  %v559_v37 = vmul.f32 %v557_v30, %v556_v38 }
 0x432   :  { %920 = vmatmul.msk.f32.vlgmr.msrb.gmra.mxu0 %vm130_vm4, %v561_v40  ;;  %v562_v41 = vadd.f32 %v560_v35, %v559_v37 }
 0x43a   :  { %921 = vmatmul.msk.f32.gmra.mxu0 %vm130_vm4, %v562_v41 }
 0x4af   :  { %v602_v43 = vpop.f32.mrf.mxu0 }
 0x4b0   :  { %v603_v44 = vadd.f32 %v942_v42, %v602_v43 }
 0x4b2   :  { %922 = vmatpush.xpose.msk.msrb.mxu1 %vm130_vm4, %v603_v44 }
 0x4b5   :  { %923 = vmatmul.msk.f32.vlgmr.msrb.gmra.mxu1 %vm130_vm4, %v603_v44 }
 0x4b7   :  { %v605_v46 = vpop.f32.mrf.mxu0 }
 0x4b8   :  { %v606_v47 = vadd.f32 %v942_v42, %v605_v46 }
 0x4ba   :  { %924 = vmatpush.xpose.msk.msra.mxu1 %vm130_vm4, %v606_v47  ;;  %746 = vmatpush.msrb.mxu2 %v606_v47 }
 0x4bd   :  { %925 = vmatmul.msk.f32.vlgmr.msra.gmra.mxu1 %vm130_vm4, %v606_v47 }
 0x4be   :  { %723 = vmatpush.msrb.mxu1 %v603_v44 }
 0x532   :  { %v628_v49 = vpop.f32.mrf.mxu1 }
 0x533   :  { %v654_v50 = vmul.f32 0.10206208, %v628_v49 }
 0x535   :  { %v657_v52 = vsel %vm656_vm6, %v654_v50, -inf }
 0x536   :  { %658 = vmax.xlane.f32.xlu0 %v657_v52 }
 0x53a   :  { %v651_v53 = vpop.f32.mrf.mxu1 }
 0x53b   :  { %v655_v54 = vmul.f32 0.10206208, %v651_v53 }
 0x53d   :  { %v660_v55 = vsel %vm656_vm6, %v655_v54, -inf }
 0x53e   :  { %661 = vmax.xlane.f32.xlu2 %v660_v55 }
 0x5a9   :  { %v659_v58 = vpop.xlane.xlu0 %658 }
 0x5aa   :  { %v663_v59 = vsub.f32 %v654_v50, %v659_v58 }
 0x5ac   :  { %v665_v56 = vmul.f32 1.442695, %v663_v59  ;;  %v798_v59 = vperm.slane %v1337_v48, 7 }
 0x5ae   :  { %969 = vpow2.f32 %v665_v56 }
 0x5b1   :  { %v662_v60 = vpop.xlane.xlu2 %661 }
 0x5b2   :  { %v664_v61 = vsub.f32 %v655_v54, %v662_v60  ;;  %v795_v54 = vperm.slane %v1337_v48, 6 }
 0x5b4   :  { %v970_v62 = vpop.eup %969  ;;  %v667_v51 = vmul.f32 1.442695, %v664_v61 }
 0x5b5   :  { %v669_v45 = vsel %vm656_vm6, %v970_v62, 0.0 }
 0x5b6   :  { %971 = vpow2.f32 %v667_v51  ;;  %670 = vadd.xlane.f32.xlu1 %v669_v45 }
 0x5bc   :  { %v972_v5 = vpop.eup %971 }
 0x5bd   :  { %v672_v63 = vsel %vm656_vm6, %v972_v5, 0.0 }
 0x5be   :  { %673 = vadd.xlane.f32.xlu2 %v672_v63 }
 0x629   :  { %v671_v0 = vpop.xlane.xlu1 %670 }
 0x62a   :  { %973 = vrcp.f32 %v671_v0  ;;  %v686_v6 = vand.u32 2147483648, %v671_v0  ;;  %v684_v8 = vand.u32 2147483647, %v671_v0  ;;  %vm680_vm8 = vweird.f32 %v671_v0 }
 0x62c   :  { %v687_v11 = vor.u32 1.1754944e-38, %v686_v6  ;;  %vm685_vm10 = vcmp.eq.f32.partialorder %v684_v8, 8.507059e+37 }
 0x630   :  { %v974_v1 = vpop.eup %973 }
 0x631   :  { %v676_v2 = vmul.f32 %v974_v1, %v671_v0  ;;  %v674_v3 = vpop.xlane.xlu2 %673  ;;  %vm681_vm7 = vweird.f32 %v974_v1 }
 0x632   :  { %975 = vrcp.f32 %v674_v3  ;;  %vm682_vm9 = vmor %vm680_vm8, %vm681_vm7  ;;  %v700_v16 = vand.u32 2147483648, %v674_v3  ;;  %v698_v18 = vand.u32 2147483647, %v674_v3  ;;  %vm694_vm12 = vweird.f32 %v674_v3 }
 0x633   :  { %v677_v4 = vsub.f32 1.0, %v676_v2 }
 0x634   :  { %v701_v21 = vor.u32 1.1754944e-38, %v700_v16  ;;  %vm699_vm14 = vcmp.eq.f32.partialorder %v698_v18, 8.507059e+37 }
 0x635   :  { %v678_v7 = vmul.f32 %v974_v1, %v677_v4 }
 0x637   :  { %v679_v9 = vadd.f32 %v974_v1, %v678_v7 }
 0x638   :  { %v976_v10 = vpop.eup %975 }
 0x639   :  { %v683_v12 = vsel %vm682_vm9, %v974_v1, %v679_v9  ;;  %v690_v57 = vmul.f32 %v976_v10, %v674_v3  ;;  %vm695_vm11 = vweird.f32 %v976_v10 }
 0x63a   :  { %v688_v13 = vsel %vm685_vm10, %v687_v11, %v683_v12  ;;  %vm696_vm13 = vmor %vm694_vm12, %vm695_vm11 }
 0x63b   :  { %v691_v14 = vsub.f32 1.0, %v690_v57  ;;  %v703_v15 = vmul.f32 %v970_v62, %v688_v13 }
 0x63d   :  { %v692_v17 = vmul.f32 %v976_v10, %v691_v14  ;;  %926 = vmatmul.msk.f32.vlgmr.msrb.gmra.mxu1 %vm656_vm6, %v703_v15 }
 0x63f   :  { %v693_v19 = vadd.f32 %v976_v10, %v692_v17 }
 0x641   :  { %v697_v22 = vsel %vm696_vm13, %v976_v10, %v693_v19 }
 0x642   :  { %v702_v20 = vsel %vm699_vm14, %v701_v21, %v697_v22 }
 0x643   :  { %v704_v23 = vmul.f32 %v972_v5, %v702_v20 }
 0x645   :  { %927 = vmatmul.msk.f32.vlgmr.msrb.gmra.mxu2 %vm656_vm6, %v704_v23 }
 0x6ba   :  { %v725_v24 = vpop.f32.mrf.mxu1 }
 0x6bb   :  { %v751_v25 = vsel %vm130_vm4, %v725_v24, 0.0 }
 0x6bc   :  { %752 = vadd.xlane.f32.xlu0 %v751_v25 }
 0x6c8   :  { %v748_v26 = vpop.f32.mrf.mxu2 }
 0x6c9   :  { %v754_v27 = vsel %vm130_vm4, %v748_v26, 0.0 }
 0x6ca   :  { %755 = vadd.xlane.f32.xlu2 %v754_v27 }
 0x72f   :  { %v753_v28 = vpop.xlane.xlu0 %752 }
 0x730   :  { %v757_v29 = vmul.f32 %v753_v28, %v1265_v34 }
 0x732   :  { %v759_v30 = vsub.f32 %v725_v24, %v757_v29 }
 0x734   :  { %v761_v31 = vmul.f32 %v759_v30, %v759_v30 }
 0x736   :  { %v763_v32 = vsel %vm130_vm4, %v761_v31, 0.0 }
 0x737   :  { %764 = vadd.xlane.f32.xlu1 %v763_v32 }
 0x73d   :  { %v756_v33 = vpop.xlane.xlu2 %755 }
 0x73e   :  { %v758_v35 = vmul.f32 %v756_v33, %v1265_v34 }
 0x740   :  { %v760_v36 = vsub.f32 %v748_v26, %v758_v35 }
 0x742   :  { %v762_v39 = vmul.f32 %v760_v36, %v760_v36 }
 0x744   :  { %v766_v40 = vsel %vm130_vm4, %v762_v39, 0.0 }
 0x745   :  { %767 = vadd.xlane.f32.xlu0 %v766_v40 }
 0x7aa   :  { %v765_v38 = vpop.xlane.xlu1 %764 }
 0x7ab   :  { %v769_v37 = vmul.f32 %v765_v38, %v1265_v34 }
 0x7ad   :  { %v771_v41 = vadd.f32 1e-12, %v769_v37 }
 0x7af   :  { %977 = vrsqrt.f32 %v771_v41  ;;  %vm779_vm0 = vweird.f32 %v771_v41 }
 0x7b5   :  { %v978_v42 = vpop.eup %977 }
 0x7b6   :  { %v774_v43 = vmul.f32 %v978_v42, %v771_v41  ;;  %vm780_vm15 = vweird.f32 %v978_v42 }
 0x7b7   :  { %vm781_vm2 = vmor %vm779_vm0, %vm780_vm15  ;;  %vm875_vm15 = vcmask 1048320  }
 0x7b8   :  { %v775_v44 = vmul.f32 %v978_v42, %v774_v43  ;;  %v768_v46 = vpop.xlane.xlu0 %767 }
 0x7b9   :  { %v770_v47 = vmul.f32 %v768_v46, %v1265_v34 }
 0x7ba   :  { %v776_v49 = vmul.f32 0.5, %v775_v44 }
 0x7bb   :  { %v772_v50 = vadd.f32 1e-12, %v770_v47 }
 0x7bc   :  { %v777_v52 = vsub.f32 1.5, %v776_v49 }
 0x7bd   :  { %979 = vrsqrt.f32 %v772_v50  ;;  %vm789_vm5 = vweird.f32 %v772_v50 }
 0x7be   :  { %v778_v53 = vmul.f32 %v978_v42, %v777_v52 }
 0x7c0   :  { %v782_v55 = vsel %vm781_vm2, %v978_v42, %v778_v53 }
 0x7c1   :  { %v793_v58 = vmul.f32 %v782_v55, %v759_v30 }
 0x7c3   :  { %v980_v56 = vpop.eup %979  ;;  %v796_v60 = vmul.f32 %v795_v54, %v793_v58 }
 0x7c4   :  { %v784_v61 = vmul.f32 %v980_v56, %v772_v50  ;;  %vm790_vm3 = vweird.f32 %v980_v56 }
 0x7c5   :  { %v799_v62 = vadd.f32 %v798_v59, %v796_v60  ;;  %vm791_vm6 = vmor %vm789_vm5, %vm790_vm3 }
 0x7c6   :  { %v785_v51 = vmul.f32 %v980_v56, %v784_v61 }
 0x7c7   :  { %869 = vrot.lane.b32.xlu2 %v799_v62, %s1179_s7  ;;  %v801_v34 = vsel %vm130_vm4, %v799_v62, -inf  ;;  %v878_v45 = vand.u32 2147483647, %v799_v62 }
 0x7c8   :  { %v786_v5 = vmul.f32 0.5, %v785_v51  ;;  %v802_v63 = vrot.slane %v801_v34, 4 }
 0x7c9   :  { %882 = vrot.lane.b32.xlu0 %v878_v45, %s1179_s7 }
 0x7ca   :  { %v787_v0 = vsub.f32 1.5, %v786_v5  ;;  %v803_v1 = vmax.f32 %v801_v34, %v802_v63 }
 0x7cc   :  { %v788_v2 = vmul.f32 %v980_v56, %v787_v0  ;;  %v804_v3 = vrot.slane %v803_v1, 2 }
 0x7ce   :  { %v792_v48 = vsel %vm791_vm6, %v980_v56, %v788_v2  ;;  %v805_v4 = vmax.f32 %v803_v1, %v804_v3 }
 0x7cf   :  { %v794_v6 = vmul.f32 %v792_v48, %v760_v36 }
 0x7d0   :  { %v806_v7 = vrot.slane %v805_v4, 1 }
 0x7d1   :  { %v797_v8 = vmul.f32 %v795_v54, %v794_v6 }
 0x7d2   :  { %v807_v9 = vmax.f32 %v805_v4, %v806_v7 }
 0x7d3   :  { %v800_v10 = vadd.f32 %v798_v59, %v797_v8 }
 0x7d4   :  { %v815_v11 = vsub.f32 %v799_v62, %v807_v9 }
 0x7d5   :  { %871 = vrot.lane.b32.xlu1 %v800_v10, %s1179_s7  ;;  %v808_v12 = vsel %vm130_vm4, %v800_v10, -inf  ;;  %v879_v57 = vand.u32 2147483647, %v800_v10 }
 0x7d6   :  { %v817_v13 = vmul.f32 1.442695, %v815_v11  ;;  %v809_v14 = vrot.slane %v808_v12, 4 }
 0x7d7   :  { %884 = vrot.lane.b32.xlu2 %v879_v57, %s1179_s7 }
 0x7d8   :  { %981 = vpow2.f32 %v817_v13  ;;  %v810_v15 = vmax.f32 %v808_v12, %v809_v14 }
 0x7da   :  { %v811_v16 = vrot.slane %v810_v15, 2 }
 0x7dc   :  { %v812_v17 = vmax.f32 %v810_v15, %v811_v16 }
 0x7de   :  { %v982_v18 = vpop.eup %981  ;;  %v813_v19 = vrot.slane %v812_v17, 1 }
 0x7df   :  { %v821_v21 = vsel %vm130_vm4, %v982_v18, 0.0 }
 0x7e0   :  { %v822_v22 = vrot.slane %v821_v21, 4  ;;  %v814_v20 = vmax.f32 %v812_v17, %v813_v19 }
 0x7e2   :  { %v823_v23 = vadd.f32 %v822_v22, %v821_v21  ;;  %v816_v24 = vsub.f32 %v800_v10, %v814_v20 }
 0x7e4   :  { %v824_v25 = vrot.slane %v823_v23, 2  ;;  %v819_v26 = vmul.f32 1.442695, %v816_v24 }
 0x7e6   :  { %v825_v27 = vadd.f32 %v824_v25, %v823_v23  ;;  %983 = vpow2.f32 %v819_v26 }
 0x7e8   :  { %v826_v28 = vrot.slane %v825_v27, 1 }
 0x7ea   :  { %v827_v29 = vadd.f32 %v826_v28, %v825_v27 }
 0x7ec   :  { %v984_v30 = vpop.eup %983  ;;  %985 = vrcp.f32 %v827_v29  ;;  %v846_v41 = vand.u32 2147483648, %v827_v29  ;;  %v844_v43 = vand.u32 2147483647, %v827_v29  ;;  %vm840_vm8 = vweird.f32 %v827_v29 }
 0x7ed   :  { %v828_v31 = vsel %vm130_vm4, %v984_v30, 0.0 }
 0x7ee   :  { %v829_v32 = vrot.slane %v828_v31, 4  ;;  %v847_v47 = vor.u32 1.1754944e-38, %v846_v41  ;;  %vm845_vm10 = vcmp.eq.f32.partialorder %v844_v43, 8.507059e+37 }
 0x7f0   :  { %v830_v33 = vadd.f32 %v829_v32, %v828_v31 }
 0x7f2   :  { %v986_v35 = vpop.eup %985  ;;  %v831_v36 = vrot.slane %v830_v33, 2 }
 0x7f3   :  { %v836_v39 = vmul.f32 %v986_v35, %v827_v29  ;;  %vm841_vm7 = vweird.f32 %v986_v35 }
 0x7f4   :  { %v832_v40 = vadd.f32 %v831_v36, %v830_v33  ;;  %vm842_vm9 = vmor %vm840_vm8, %vm841_vm7 }
 0x7f5   :  { %v837_v38 = vsub.f32 1.0, %v836_v39 }
 0x7f6   :  { %v833_v37 = vrot.slane %v832_v40, 1 }
 0x7f7   :  { %v838_v42 = vmul.f32 %v986_v35, %v837_v38 }
 0x7f8   :  { %v834_v44 = vadd.f32 %v833_v37, %v832_v40 }
 0x7f9   :  { %v839_v46 = vadd.f32 %v986_v35, %v838_v42 }
 0x7fa   :  { %987 = vrcp.f32 %v834_v44  ;;  %v860_v58 = vand.u32 2147483648, %v834_v44  ;;  %v858_v56 = vand.u32 2147483647, %v834_v44  ;;  %vm854_vm12 = vweird.f32 %v834_v44 }
 0x7fb   :  { %v843_v49 = vsel %vm842_vm9, %v986_v35, %v839_v46 }
 0x7fc   :  { %v848_v50 = vsel %vm845_vm10, %v847_v47, %v843_v49  ;;  %v861_v61 = vor.u32 1.1754944e-38, %v860_v58  ;;  %vm859_vm14 = vcmp.eq.f32.partialorder %v858_v56, 8.507059e+37 }
 0x7fd   :  { %v863_v52 = vmul.f32 %v982_v18, %v848_v50 }
 0x7ff   :  { %865 = vst.msk [vmem:[#allocation13] sm:$0xff] %vm130_vm4, %v863_v52 }
 0x800   :  { %v988_v53 = vpop.eup %987 }
 0x801   :  { %v850_v54 = vmul.f32 %v988_v53, %v834_v44  ;;  %vm855_vm11 = vweird.f32 %v988_v53 }
 0x802   :  { %vm856_vm13 = vmor %vm854_vm12, %vm855_vm11 }
 0x803   :  { %v851_v55 = vsub.f32 1.0, %v850_v54 }
 0x805   :  { %v852_v59 = vmul.f32 %v988_v53, %v851_v55 }
 0x807   :  { %v853_v60 = vadd.f32 %v988_v53, %v852_v59 }
 0x809   :  { %v857_v62 = vsel %vm856_vm13, %v988_v53, %v853_v60 }
 0x80a   :  { %v862_v51 = vsel %vm859_vm14, %v861_v61, %v857_v62 }
 0x80b   :  { %v864_v34 = vmul.f32 %v984_v30, %v862_v51 }
 0x80d   :  { %866 = vst.msk [vmem:[#allocation13 + $0x10] sm:$0xff] %vm130_vm4, %v864_v34 }
 0x821   :  { %v870_v45 = vpop.permute.xlu2 %869 }
 0x822   :  { %876 = vst.msk [vmem:[#allocation13] sm:$0xff] %vm875_vm15, %v870_v45 }
 0x831   :  { %v885_v5 = vpop.permute.xlu2 %884 }
 0x832   :  { %889 = vst.msk [vmem:[#allocation13 + $0x18] sm:$0xff] %vm305_vm1, %v885_v5 }
 0x83b   :  { %v883_v63 = vpop.permute.xlu0 %882 }
 0x83c   :  { %888 = vst.msk [vmem:[#allocation13 + $0x8] sm:$0xff] %vm305_vm1, %v883_v63 }
 0x847   :  { %v872_v0 = vpop.permute.xlu1 %871 }
 0x848   :  { %877 = vst.msk [vmem:[#allocation13 + $0x10] sm:$0xff] %vm875_vm15, %v872_v0 }
 0x849   :  { %902 = dma.vmem_to_hbm [thread:$0]  %s895_s23, 512, %s897_s4, [#allocation4], %s1169_s1, %s1169_s1, %s1170_s22  }
 0x84a   :  { %1165 = dma.done.wait [#allocation4], 512  }
 0x84b   :  { %1166 = vsyncadd [#allocation4], 4294966784 }
 0x84c   :  { %907 = vsyncpa [#allocation3], 1 }
 0x84d   :  { %908 = vsyncpa [#allocation6], 1 }
 0x84e   :  { %909 = vsyncpa [#allocation9], 1 }
 0x84f   :  { %910 = vsyncpa [#allocation12], 1 }
 0x850   :  { %911 = vsyncpa [#allocation4], 1 }

</bundles_post_ra>
